<compile_context>
chip_gen: v5e
topology: v5e:2x2
jax: 0.10.0
libtpu: 0.0.40
codegen_flags: <defaults>
</compile_context>

<pallas_src>
import functools
import math

import jax
import jax.numpy as jnp
from jax.experimental import pallas as pl
from jax.experimental.pallas import tpu as pltpu


# ----------------------------------------------------------------------------
# Fused Pallas kernel: grid = (batch_blocks, layer)
# ----------------------------------------------------------------------------
def fused_encoder_kernel(
    pe_ref, x_ref,
    wqkv_ref, bqkv_ref,          # fused QKV weight (E,3E) / bias (1,3E), Q pre-scaled
    wo_ref,                      # output projection Wo.T (E,E)
    vec_ref,                     # packed per-layer vectors (6,E): bo,g1,be1,b2,g2,be2
    w1_ref, b1_ref, w2_ref,      # FFN
    o_ref,
    xs_ref,                      # VMEM scratch: activation carried across layers
    *, num_heads, block_b):
    H = num_heads
    Bb = block_b
    eps = 1e-5
    bf16 = jnp.bfloat16
    f32 = jnp.float32
    layer = pl.program_id(1)

    S, E = pe_ref.shape
    hd = E // H
    M = Bb * S

    # First layer step for this batch block: load input + sinusoidal pos-enc,
    # folded to (Bb*S, E) so every matmul below runs at M = Bb*S rows.
    @pl.when(layer == 0)
    def _():
        xs_ref[...] = (x_ref[...] + pe_ref[...][None]).reshape(M, E)

    x = xs_ref[...]                                   # (M, E) f32, VMEM-resident

    # ---- fused QKV projection: one flat matmul, full MXU N occupancy ----
    # 1/sqrt(hd) is pre-folded into the Q columns of wqkv / bqkv host-side.
    qkv = jnp.dot(x.astype(bf16), wqkv_ref[0],
                  preferred_element_type=f32) + bqkv_ref[0]          # (M, 3E)

    # ---- relayout to per-(head, sequence-in-block) batches (XLU work only) ----
    # TODO(synk): at large S replace with flash-style KV blocking (online
    # softmax over tk tiles) so the (H*Bb, S, S) scores stay bounded on v7x.
    def split_heads(off):          # cols [off, off+E) of qkv -> (H*Bb, S, hd)
        return jnp.stack(
            [qkv[:, off + h * hd: off + (h + 1) * hd] for h in range(H)],
            axis=0).reshape(H * Bb, S, hd)

    q = split_heads(0)
    k = split_heads(E)
    v = split_heads(2 * E)

    s = jnp.einsum('bqd,bkd->bqk', q.astype(bf16), k.astype(bf16),
                   preferred_element_type=f32)                       # (H*Bb, S, S)
    s = s - jnp.max(s, axis=-1, keepdims=True)
    p = jnp.exp(s)
    p = p * pl.reciprocal(jnp.sum(p, axis=-1, keepdims=True), approx=True)
    o = jnp.einsum('bqk,bkd->bqd', p.astype(bf16), v.astype(bf16),
                   preferred_element_type=f32)                       # (H*Bb, S, hd)

    # ---- merge heads (lane concat) + single (M,E)@(E,E) output projection ----
    oh = o.reshape(H, M, hd)
    o_cat = jnp.concatenate([oh[h] for h in range(H)], axis=-1)      # (M, E)

    vecs = vec_ref[0]                                                # (6, E) f32
    bo, g1, be1, b2, g2, be2 = (vecs[i:i + 1] for i in range(6))

    attn = jnp.dot(o_cat.astype(bf16), wo_ref[0],
                   preferred_element_type=f32) + bo                  # (M, E)

    # ---- add & layernorm 1 (f32 elementwise) ----
    y = x + attn
    mu = jnp.mean(y, axis=-1, keepdims=True)
    var = jnp.mean((y - mu) ** 2, axis=-1, keepdims=True)
    y = (y - mu) * jax.lax.rsqrt(var + eps) * g1 + be1

    # ---- feed-forward: Linear -> ReLU -> Linear (bf16 matmuls, f32 accum) ----
    # TODO(synk): for realistic E/F on v7x (64 MiB VMEM), add an F-tiled inner
    # loop / grid axis for linear1/linear2 instead of whole (E,F)/(F,E) weights.
    h1 = jnp.dot(y.astype(bf16), w1_ref[0],
                 preferred_element_type=f32) + b1_ref[0]             # (M, F)
    h1 = jnp.maximum(h1, 0.0)
    ff = jnp.dot(h1.astype(bf16), w2_ref[0],
                 preferred_element_type=f32) + b2                    # (M, E)

    # ---- add & layernorm 2 ----
    z = y + ff
    mu2 = jnp.mean(z, axis=-1, keepdims=True)
    var2 = jnp.mean((z - mu2) ** 2, axis=-1, keepdims=True)
    z = (z - mu2) * jax.lax.rsqrt(var2 + eps) * g2 + be2

    xs_ref[...] = z                                   # carry to next layer step

    @pl.when(layer == pl.num_programs(1) - 1)
    def _():
        o_ref[...] = z.reshape(Bb, S, E)


# ----------------------------------------------------------------------------
# Wrapper: one pallas_call for the whole encoder stack
# ----------------------------------------------------------------------------
def _vmem_limit_bytes():
    # Review: 32 MiB scoped default wastes most of v5e/v6e's 128 MiB; keep a
    # margin so the same setting stays within v7x's 64 MiB per-TensorCore.
    try:
        cap = pltpu.get_tpu_info().vmem_capacity_bytes
    except Exception:
        cap = 64 * 1024 * 1024
    return max(32 * 1024 * 1024, min(cap - 16 * 1024 * 1024, 100 * 1024 * 1024))


def transformer_encoder(x, pe, packed, *, num_heads, block_b=None):
    B, S, E = x.shape
    L = packed["wqkv"].shape[0]
    F = packed["w1"].shape[-1]
    Bb = B if block_b is None else block_b
    assert B % Bb == 0

    def wspec(shape):              # per-layer weight: block (1, ...) indexed by l
        nd = len(shape)
        return pl.BlockSpec((1,) + shape[1:],
                            lambda b, l, _n=nd: (l,) + (0,) * (_n - 1))

    in_specs = [
        pl.BlockSpec((S, E), lambda b, l: (0, 0)),            # positional encoding
        pl.BlockSpec((Bb, S, E), lambda b, l: (b, 0, 0)),     # x (batch block)
        wspec((L, E, 3 * E)),                                 # fused wqkv
        wspec((L, 1, 3 * E)),                                 # fused bqkv
        wspec((L, E, E)),                                     # wo (= Wo.T)
        wspec((L, 6, E)),                                     # packed small vectors
        wspec((L, E, F)),                                     # linear1 weight
        wspec((L, 1, F)),                                     # linear1 bias
        wspec((L, F, E)),                                     # linear2 weight
    ]

    kernel = functools.partial(fused_encoder_kernel,
                               num_heads=num_heads, block_b=Bb)
    return pl.pallas_call(
        kernel,
        out_shape=jax.ShapeDtypeStruct((B, S, E), jnp.float32),
        grid=(B // Bb, L),
        in_specs=in_specs,
        out_specs=pl.BlockSpec((Bb, S, E), lambda b, l: (b, 0, 0)),
        scratch_shapes=[pltpu.VMEM((Bb * S, E), jnp.float32)],
        compiler_params=pltpu.CompilerParams(
            dimension_semantics=("parallel", "arbitrary"),
            vmem_limit_bytes=_vmem_limit_bytes()),
    )(pe, x, packed["wqkv"], packed["bqkv"], packed["wo"], packed["vecs"],
      packed["w1"], packed["b1"], packed["w2"])


# ----------------------------------------------------------------------------
# Host-side parameter packing: PyTorch layout -> fused / pre-transposed /
# layer-stacked bf16 matmul weights (biases & LN params stay f32).
# ----------------------------------------------------------------------------
def pack_params(block_params, num_heads):
    H = num_heads
    wqkv, bqkv, wo, vecs, w1, b1, w2 = [], [], [], [], [], [], []
    for p in block_params:
        E = p["wo"].shape[0]
        hd = E // H
        scale = 1.0 / math.sqrt(hd)
        # Fused QKV weight (in=E, out=3E), columns = [Q | K | V]; fold the
        # attention scale into the Q columns (weight + bias).
        w = p["wqkv"].T
        w = w.at[:, :E].multiply(scale)
        b = p["bqkv"][0]
        b = b.at[:E].multiply(scale)
        wqkv.append(w.astype(jnp.bfloat16))
        bqkv.append(b.reshape(1, 3 * E))
        wo.append(p["wo"].T.astype(jnp.bfloat16))             # (E, E)
        # Coalesced per-layer vectors (6, E): bo, g1, be1, b2, g2, be2.
        vecs.append(jnp.concatenate(
            [p["bo"], p["g1"], p["be1"], p["bb2"], p["g2"], p["be2"]], axis=0))
        w1.append(p["w1"].T.astype(jnp.bfloat16))             # (E, F)
        b1.append(p["bb1"])                                   # (1, F)
        w2.append(p["w2"].T.astype(jnp.bfloat16))             # (F, E)
    return dict(wqkv=jnp.stack(wqkv), bqkv=jnp.stack(bqkv), wo=jnp.stack(wo),
                vecs=jnp.stack(vecs), w1=jnp.stack(w1), b1=jnp.stack(b1),
                w2=jnp.stack(w2))


# ----------------------------------------------------------------------------
# Parameter / buffer construction (deterministic, in-script)
# ----------------------------------------------------------------------------
def make_positional_encoding(seq_len, embed_dim):
    position = jnp.arange(seq_len, dtype=jnp.float32)[:, None]
    div_term = jnp.exp(jnp.arange(0, embed_dim, 2, dtype=jnp.float32)
                       * -(math.log(10000.0) / embed_dim))
    pe = jnp.zeros((seq_len, embed_dim), jnp.float32)
    pe = pe.at[:, 0::2].set(jnp.sin(position * div_term))
    pe = pe.at[:, 1::2].set(jnp.cos(position * div_term))  # embed_dim is even
    return pe


def init_block_params(key, embed_dim, ff_dim):
    E, F = embed_dim, ff_dim
    ks = jax.random.split(key, 8)
    s = 0.05
    return dict(
        wqkv=s * jax.random.normal(ks[0], (3 * E, E), jnp.float32),
        bqkv=s * jax.random.normal(ks[1], (1, 3 * E), jnp.float32),
        wo=s * jax.random.normal(ks[2], (E, E), jnp.float32),
        bo=s * jax.random.normal(ks[3], (1, E), jnp.float32),
        g1=jnp.ones((1, E), jnp.float32),
        be1=jnp.zeros((1, E), jnp.float32),
        w1=s * jax.random.normal(ks[4], (F, E), jnp.float32),
        bb1=s * jax.random.normal(ks[5], (1, F), jnp.float32),
        w2=s * jax.random.normal(ks[6], (E, F), jnp.float32),
        bb2=s * jax.random.normal(ks[7], (1, E), jnp.float32),
        g2=jnp.ones((1, E), jnp.float32),
        be2=jnp.zeros((1, E), jnp.float32),
    )


# ----------------------------------------------------------------------------
# Pure-JAX f32 reference (PyTorch-equivalent semantics)
# ----------------------------------------------------------------------------
def ref_forward(x, pe, block_params, *, num_heads):
    def layernorm(v, g, b):
        mu = jnp.mean(v, -1, keepdims=True)
        var = jnp.mean((v - mu) ** 2, -1, keepdims=True)
        return (v - mu) * jax.lax.rsqrt(var + 1e-5) * g + b

    x = x + pe[None]
    E = x.shape[-1]
    hd = E // num_heads
    for p in block_params:
        qkv = x @ p["wqkv"].T + p["bqkv"]
        q, k, v = qkv[..., :E], qkv[..., E:2 * E], qkv[..., 2 * E:]
        outs = []
        for h in range(num_heads):
            qh = q[..., h * hd:(h + 1) * hd] / math.sqrt(hd)
            kh = k[..., h * hd:(h + 1) * hd]
            vh = v[..., h * hd:(h + 1) * hd]
            s = jnp.einsum("bqd,bkd->bqk", qh, kh)
            outs.append(jnp.einsum("bqk,bkd->bqd", jax.nn.softmax(s, -1), vh))
        attn = jnp.concatenate(outs, -1) @ p["wo"].T + p["bo"]
        x = layernorm(x + attn, p["g1"], p["be1"])
        ff = jnp.maximum(x @ p["w1"].T + p["bb1"], 0.0) @ p["w2"].T + p["bb2"]
        x = layernorm(x + ff, p["g2"], p["be2"])
    return x


# ----------------------------------------------------------------------------
if __name__ == "__main__":
    B, S, E, H, FF = 4, 8, 32, 4, 64
    NUM_BLOCKS = 2
    BLOCK_B = 2            # Bb sequences per grid step; B/Bb = 2 (even, v7x megacore)

    key = jax.random.PRNGKey(0)
    k_x, k_p = jax.random.split(key)
    x = jax.random.normal(k_x, (B, S, E), jnp.float32)
    pe = make_positional_encoding(S, E)
    block_params = [init_block_params(jax.random.fold_in(k_p, i), E, FF)
                    for i in range(NUM_BLOCKS)]
    packed = pack_params(block_params, num_heads=H)

    out = transformer_encoder(x, pe, packed, num_heads=H, block_b=BLOCK_B)
    out = jax.block_until_ready(out)

    ref = jax.block_until_ready(ref_forward(x, pe, block_params, num_heads=H))
    assert out.shape == (B, S, E)
    # bf16 matmul inputs (f32 accumulation) + approx reciprocal => slightly
    # looser tolerance than a pure-f32 comparison.
    assert jnp.allclose(out, ref, atol=3e-2, rtol=3e-2), \
        float(jnp.max(jnp.abs(out - ref)))

    print("KERNEL_OK")
</pallas_src>

<mosaic_0001>
module attributes {stable_mosaic.version = 11 : i64} {
  func.func @fused_encoder_kernel(%arg0: i32, %arg1: i32, %arg2: memref<8x32xf32, #tpu.memory_space<vmem>>, %arg3: memref<2x8x32xf32, #tpu.memory_space<vmem>>, %arg4: memref<1x32x96xbf16, #tpu.memory_space<vmem>>, %arg5: memref<1x1x96xf32, #tpu.memory_space<vmem>>, %arg6: memref<1x32x32xbf16, #tpu.memory_space<vmem>>, %arg7: memref<1x6x32xf32, #tpu.memory_space<vmem>>, %arg8: memref<1x32x64xbf16, #tpu.memory_space<vmem>>, %arg9: memref<1x1x64xf32, #tpu.memory_space<vmem>>, %arg10: memref<1x64x32xbf16, #tpu.memory_space<vmem>>, %arg11: memref<2x8x32xf32, #tpu.memory_space<vmem>>, %arg12: memref<16x32xf32, #tpu.memory_space<vmem>>) attributes {dimension_semantics = [#tpu.dimension_semantics<parallel>, #tpu.dimension_semantics<arbitrary>], iteration_bounds = array<i64: 2, 2>, scalar_prefetch = 0 : i64, scratch_operands = 1 : i64, tpu.core_type = #tpu.core_type<tc>, window_params = [{pipeline_mode = #tpu.pipeline_mode<synchronous>, transform_indices = @transform_0, window_bounds = array<i64: 8, 32>}, {transform_indices = @transform_1, window_bounds = array<i64: 2, 8, 32>}, {transform_indices = @transform_2, window_bounds = array<i64: 1, 32, 96>}, {transform_indices = @transform_3, window_bounds = array<i64: 1, 1, 96>}, {transform_indices = @transform_4, window_bounds = array<i64: 1, 32, 32>}, {transform_indices = @transform_5, window_bounds = array<i64: 1, 6, 32>}, {transform_indices = @transform_6, window_bounds = array<i64: 1, 32, 64>}, {transform_indices = @transform_7, window_bounds = array<i64: 1, 1, 64>}, {transform_indices = @transform_8, window_bounds = array<i64: 1, 64, 32>}, {transform_indices = @transform_9, window_bounds = array<i64: 2, 8, 32>}]} {
    %c0_i32 = arith.constant 0 : i32
    %0 = arith.cmpi eq, %arg1, %c0_i32 : i32
    %1 = arith.extui %0 : i1 to i32
    %c0_i32_0 = arith.constant 0 : i32
    %2 = arith.cmpi ne, %1, %c0_i32_0 : i32
    scf.if %2 {
      %c0_44 = arith.constant 0 : index
      %c0_45 = arith.constant 0 : index
      %c0_46 = arith.constant 0 : index
      %148 = vector.load %arg3[%c0_44, %c0_45, %c0_46] : memref<2x8x32xf32, #tpu.memory_space<vmem>>, vector<2x8x32xf32>
      %c0_47 = arith.constant 0 : index
      %c0_48 = arith.constant 0 : index
      %149 = vector.load %arg2[%c0_47, %c0_48] : memref<8x32xf32, #tpu.memory_space<vmem>>, vector<8x32xf32>
      %150 = vector.shape_cast %149 : vector<8x32xf32> to vector<1x8x32xf32>
      %151 = vector.broadcast %150 : vector<1x8x32xf32> to vector<2x8x32xf32>
      %152 = arith.addf %148, %151 : vector<2x8x32xf32>
      %153 = vector.shape_cast %152 : vector<2x8x32xf32> to vector<16x32xf32>
      %c0_49 = arith.constant 0 : index
      %c0_50 = arith.constant 0 : index
      %154 = vector.load %arg12[%c0_49, %c0_50] : memref<16x32xf32, #tpu.memory_space<vmem>>, vector<16x32xf32>
      tpu.vector_store %arg12[%c0_49, %c0_50], %153 {strides = array<i32>} : memref<16x32xf32, #tpu.memory_space<vmem>>, vector<16x32xf32>,
    } else {
    }
    %c0 = arith.constant 0 : index
    %c0_1 = arith.constant 0 : index
    %3 = vector.load %arg12[%c0, %c0_1] : memref<16x32xf32, #tpu.memory_space<vmem>>, vector<16x32xf32>
    %4 = arith.truncf %3 : vector<16x32xf32> to vector<16x32xbf16>
    %c0_2 = arith.constant 0 : index
    %c0_3 = arith.constant 0 : index
    %c0_4 = arith.constant 0 : index
    %5 = vector.load %arg4[%c0_2, %c0_3, %c0_4] : memref<1x32x96xbf16, #tpu.memory_space<vmem>>, vector<1x32x96xbf16>
    %6 = vector.shape_cast %5 : vector<1x32x96xbf16> to vector<32x96xbf16>
    %cst = arith.constant dense<0.000000e+00> : vector<16x96xf32>
    %7 = tpu.matmul %4, %6, %cst {dimension_numbers = #tpu.dot_dimension_numbers<[1], [0], [0], [1], [0, 0, 1, 1], [], []>} : vector<16x32xbf16>, vector<32x96xbf16>, vector<16x96xf32> -> vector<16x96xf32>
    %c0_5 = arith.constant 0 : index
    %c0_6 = arith.constant 0 : index
    %c0_7 = arith.constant 0 : index
    %8 = vector.load %arg5[%c0_5, %c0_6, %c0_7] : memref<1x1x96xf32, #tpu.memory_space<vmem>>, vector<1x1x96xf32>
    %9 = vector.shape_cast %8 : vector<1x1x96xf32> to vector<1x96xf32>
    %10 = vector.broadcast %9 : vector<1x96xf32> to vector<16x96xf32>
    %11 = arith.addf %7, %10 : vector<16x96xf32>
    %12 = vector.extract_strided_slice %11 {offsets = [0, 0], sizes = [16, 8], strides = [1, 1]} : vector<16x96xf32> to vector<16x8xf32>
    %13 = vector.extract_strided_slice %11 {offsets = [0, 8], sizes = [16, 8], strides = [1, 1]} : vector<16x96xf32> to vector<16x8xf32>
    %14 = vector.extract_strided_slice %11 {offsets = [0, 16], sizes = [16, 8], strides = [1, 1]} : vector<16x96xf32> to vector<16x8xf32>
    %15 = vector.extract_strided_slice %11 {offsets = [0, 24], sizes = [16, 8], strides = [1, 1]} : vector<16x96xf32> to vector<16x8xf32>
    %16 = vector.shape_cast %12 : vector<16x8xf32> to vector<1x16x8xf32>
    %17 = vector.shape_cast %13 : vector<16x8xf32> to vector<1x16x8xf32>
    %18 = vector.shape_cast %14 : vector<16x8xf32> to vector<1x16x8xf32>
    %19 = vector.shape_cast %15 : vector<16x8xf32> to vector<1x16x8xf32>
    %20 = tpu.concatenate %16, %17, %18, %19 in 0 : vector<1x16x8xf32>, vector<1x16x8xf32>, vector<1x16x8xf32>, vector<1x16x8xf32> -> vector<4x16x8xf32>
    %21 = vector.shape_cast %20 : vector<4x16x8xf32> to vector<8x8x8xf32>
    %22 = vector.extract_strided_slice %11 {offsets = [0, 32], sizes = [16, 8], strides = [1, 1]} : vector<16x96xf32> to vector<16x8xf32>
    %23 = vector.extract_strided_slice %11 {offsets = [0, 40], sizes = [16, 8], strides = [1, 1]} : vector<16x96xf32> to vector<16x8xf32>
    %24 = vector.extract_strided_slice %11 {offsets = [0, 48], sizes = [16, 8], strides = [1, 1]} : vector<16x96xf32> to vector<16x8xf32>
    %25 = vector.extract_strided_slice %11 {offsets = [0, 56], sizes = [16, 8], strides = [1, 1]} : vector<16x96xf32> to vector<16x8xf32>
    %26 = vector.shape_cast %22 : vector<16x8xf32> to vector<1x16x8xf32>
    %27 = vector.shape_cast %23 : vector<16x8xf32> to vector<1x16x8xf32>
    %28 = vector.shape_cast %24 : vector<16x8xf32> to vector<1x16x8xf32>
    %29 = vector.shape_cast %25 : vector<16x8xf32> to vector<1x16x8xf32>
    %30 = tpu.concatenate %26, %27, %28, %29 in 0 : vector<1x16x8xf32>, vector<1x16x8xf32>, vector<1x16x8xf32>, vector<1x16x8xf32> -> vector<4x16x8xf32>
    %31 = vector.shape_cast %30 : vector<4x16x8xf32> to vector<8x8x8xf32>
    %32 = vector.extract_strided_slice %11 {offsets = [0, 64], sizes = [16, 8], strides = [1, 1]} : vector<16x96xf32> to vector<16x8xf32>
    %33 = vector.extract_strided_slice %11 {offsets = [0, 72], sizes = [16, 8], strides = [1, 1]} : vector<16x96xf32> to vector<16x8xf32>
    %34 = vector.extract_strided_slice %11 {offsets = [0, 80], sizes = [16, 8], strides = [1, 1]} : vector<16x96xf32> to vector<16x8xf32>
    %35 = vector.extract_strided_slice %11 {offsets = [0, 88], sizes = [16, 8], strides = [1, 1]} : vector<16x96xf32> to vector<16x8xf32>
    %36 = vector.shape_cast %32 : vector<16x8xf32> to vector<1x16x8xf32>
    %37 = vector.shape_cast %33 : vector<16x8xf32> to vector<1x16x8xf32>
    %38 = vector.shape_cast %34 : vector<16x8xf32> to vector<1x16x8xf32>
    %39 = vector.shape_cast %35 : vector<16x8xf32> to vector<1x16x8xf32>
    %40 = tpu.concatenate %36, %37, %38, %39 in 0 : vector<1x16x8xf32>, vector<1x16x8xf32>, vector<1x16x8xf32>, vector<1x16x8xf32> -> vector<4x16x8xf32>
    %41 = vector.shape_cast %40 : vector<4x16x8xf32> to vector<8x8x8xf32>
    %42 = arith.truncf %21 : vector<8x8x8xf32> to vector<8x8x8xbf16>
    %43 = arith.truncf %31 : vector<8x8x8xf32> to vector<8x8x8xbf16>
    "tpu.trace_start"() <{level = 10 : i32, message = "bqd,bkd->bqk"}> : () -> ()
    %cst_8 = arith.constant dense<0.000000e+00> : vector<8x8x8xf32>
    %44 = tpu.matmul %42, %43, %cst_8 {dimension_numbers = #tpu.dot_dimension_numbers<[2], [2], [1], [1], [0, 0, 0, 1, 1, 1], [0], [0]>} : vector<8x8x8xbf16>, vector<8x8x8xbf16>, vector<8x8x8xf32> -> vector<8x8x8xf32>
    "tpu.trace_stop"() : () -> ()
    %cst_9 = arith.constant dense<0xFF800000> : vector<8x8xf32>
    %45 = vector.multi_reduction <maximumf>, %44, %cst_9 [2] : vector<8x8x8xf32> to vector<8x8xf32>
    %46 = vector.shape_cast %45 : vector<8x8xf32> to vector<8x8x1xf32>
    %47 = vector.broadcast %46 : vector<8x8x1xf32> to vector<8x8x8xf32>
    %48 = arith.subf %44, %47 : vector<8x8x8xf32>
    %49 = math.exp %48 : vector<8x8x8xf32>
    %cst_10 = arith.constant dense<0.000000e+00> : vector<8x8xf32>
    %50 = vector.multi_reduction <add>, %49, %cst_10 [2] : vector<8x8x8xf32> to vector<8x8xf32>
    %51 = vector.shape_cast %50 : vector<8x8xf32> to vector<8x8x1xf32>
    %52 = tpu.reciprocal %51 {approx = true} : vector<8x8x1xf32> -> vector<8x8x1xf32>
    %53 = vector.broadcast %52 : vector<8x8x1xf32> to vector<8x8x8xf32>
    %54 = arith.mulf %49, %53 : vector<8x8x8xf32>
    %55 = arith.truncf %54 : vector<8x8x8xf32> to vector<8x8x8xbf16>
    %56 = arith.truncf %41 : vector<8x8x8xf32> to vector<8x8x8xbf16>
    "tpu.trace_start"() <{level = 10 : i32, message = "bqk,bkd->bqd"}> : () -> ()
    %cst_11 = arith.constant dense<0.000000e+00> : vector<8x8x8xf32>
    %57 = tpu.matmul %55, %56, %cst_11 {dimension_numbers = #tpu.dot_dimension_numbers<[2], [1], [1], [2], [0, 0, 0, 1, 1, 2], [0], [0]>} : vector<8x8x8xbf16>, vector<8x8x8xbf16>, vector<8x8x8xf32> -> vector<8x8x8xf32>
    "tpu.trace_stop"() : () -> ()
    %58 = vector.shape_cast %57 : vector<8x8x8xf32> to vector<4x16x8xf32>
    %59 = vector.extract_strided_slice %58 {offsets = [0, 0, 0], sizes = [1, 16, 8], strides = [1, 1, 1]} : vector<4x16x8xf32> to vector<1x16x8xf32>
    %60 = vector.shape_cast %59 : vector<1x16x8xf32> to vector<16x8xf32>
    %61 = vector.extract_strided_slice %58 {offsets = [1, 0, 0], sizes = [1, 16, 8], strides = [1, 1, 1]} : vector<4x16x8xf32> to vector<1x16x8xf32>
    %62 = vector.shape_cast %61 : vector<1x16x8xf32> to vector<16x8xf32>
    %63 = vector.extract_strided_slice %58 {offsets = [2, 0, 0], sizes = [1, 16, 8], strides = [1, 1, 1]} : vector<4x16x8xf32> to vector<1x16x8xf32>
    %64 = vector.shape_cast %63 : vector<1x16x8xf32> to vector<16x8xf32>
    %65 = vector.extract_strided_slice %58 {offsets = [3, 0, 0], sizes = [1, 16, 8], strides = [1, 1, 1]} : vector<4x16x8xf32> to vector<1x16x8xf32>
    %66 = vector.shape_cast %65 : vector<1x16x8xf32> to vector<16x8xf32>
    %67 = tpu.concatenate %60, %62, %64, %66 in 1 : vector<16x8xf32>, vector<16x8xf32>, vector<16x8xf32>, vector<16x8xf32> -> vector<16x32xf32>
    %c0_12 = arith.constant 0 : index
    %c0_13 = arith.constant 0 : index
    %c0_14 = arith.constant 0 : index
    %68 = vector.load %arg7[%c0_12, %c0_13, %c0_14] : memref<1x6x32xf32, #tpu.memory_space<vmem>>, vector<1x6x32xf32>
    %69 = vector.shape_cast %68 : vector<1x6x32xf32> to vector<6x32xf32>
    %70 = vector.extract_strided_slice %69 {offsets = [0, 0], sizes = [1, 32], strides = [1, 1]} : vector<6x32xf32> to vector<1x32xf32>
    %71 = vector.extract_strided_slice %69 {offsets = [1, 0], sizes = [1, 32], strides = [1, 1]} : vector<6x32xf32> to vector<1x32xf32>
    %72 = vector.extract_strided_slice %69 {offsets = [2, 0], sizes = [1, 32], strides = [1, 1]} : vector<6x32xf32> to vector<1x32xf32>
    %73 = vector.extract_strided_slice %69 {offsets = [3, 0], sizes = [1, 32], strides = [1, 1]} : vector<6x32xf32> to vector<1x32xf32>
    %74 = vector.extract_strided_slice %69 {offsets = [4, 0], sizes = [1, 32], strides = [1, 1]} : vector<6x32xf32> to vector<1x32xf32>
    %75 = vector.extract_strided_slice %69 {offsets = [5, 0], sizes = [1, 32], strides = [1, 1]} : vector<6x32xf32> to vector<1x32xf32>
    %76 = arith.truncf %67 : vector<16x32xf32> to vector<16x32xbf16>
    %c0_15 = arith.constant 0 : index
    %c0_16 = arith.constant 0 : index
    %c0_17 = arith.constant 0 : index
    %77 = vector.load %arg6[%c0_15, %c0_16, %c0_17] : memref<1x32x32xbf16, #tpu.memory_space<vmem>>, vector<1x32x32xbf16>
    %78 = vector.shape_cast %77 : vector<1x32x32xbf16> to vector<32x32xbf16>
    %cst_18 = arith.constant dense<0.000000e+00> : vector<16x32xf32>
    %79 = tpu.matmul %76, %78, %cst_18 {dimension_numbers = #tpu.dot_dimension_numbers<[1], [0], [0], [1], [0, 0, 1, 1], [], []>} : vector<16x32xbf16>, vector<32x32xbf16>, vector<16x32xf32> -> vector<16x32xf32>
    %80 = vector.broadcast %70 : vector<1x32xf32> to vector<16x32xf32>
    %81 = arith.addf %79, %80 : vector<16x32xf32>
    %82 = arith.addf %3, %81 : vector<16x32xf32>
    %cst_19 = arith.constant dense<0.000000e+00> : vector<16xf32>
    %83 = vector.multi_reduction <add>, %82, %cst_19 [1] : vector<16x32xf32> to vector<16xf32>
    %84 = vector.shape_cast %83 : vector<16xf32> to vector<16x1xf32>
    %cst_20 = arith.constant 3.200000e+01 : f32
    %85 = vector.broadcast %cst_20 : f32 to vector<16x1xf32>
    %86 = arith.divf %84, %85 : vector<16x1xf32>
    %87 = vector.broadcast %86 : vector<16x1xf32> to vector<16x32xf32>
    %88 = arith.subf %82, %87 : vector<16x32xf32>
    %89 = arith.mulf %88, %88 : vector<16x32xf32>
    %cst_21 = arith.constant dense<0.000000e+00> : vector<16xf32>
    %90 = vector.multi_reduction <add>, %89, %cst_21 [1] : vector<16x32xf32> to vector<16xf32>
    %91 = vector.shape_cast %90 : vector<16xf32> to vector<16x1xf32>
    %cst_22 = arith.constant 3.200000e+01 : f32
    %92 = vector.broadcast %cst_22 : f32 to vector<16x1xf32>
    %93 = arith.divf %91, %92 : vector<16x1xf32>
    %94 = vector.broadcast %86 : vector<16x1xf32> to vector<16x32xf32>
    %95 = arith.subf %82, %94 : vector<16x32xf32>
    %cst_23 = arith.constant 9.99999974E-6 : f32
    %96 = vector.broadcast %cst_23 : f32 to vector<16x1xf32>
    %97 = arith.addf %93, %96 : vector<16x1xf32>
    %98 = math.rsqrt %97 : vector<16x1xf32>
    %99 = vector.broadcast %98 : vector<16x1xf32> to vector<16x32xf32>
    %100 = arith.mulf %95, %99 : vector<16x32xf32>
    %101 = vector.broadcast %71 : vector<1x32xf32> to vector<16x32xf32>
    %102 = arith.mulf %100, %101 : vector<16x32xf32>
    %103 = vector.broadcast %72 : vector<1x32xf32> to vector<16x32xf32>
    %104 = arith.addf %102, %103 : vector<16x32xf32>
    %105 = arith.truncf %104 : vector<16x32xf32> to vector<16x32xbf16>
    %c0_24 = arith.constant 0 : index
    %c0_25 = arith.constant 0 : index
    %c0_26 = arith.constant 0 : index
    %106 = vector.load %arg8[%c0_24, %c0_25, %c0_26] : memref<1x32x64xbf16, #tpu.memory_space<vmem>>, vector<1x32x64xbf16>
    %107 = vector.shape_cast %106 : vector<1x32x64xbf16> to vector<32x64xbf16>
    %cst_27 = arith.constant dense<0.000000e+00> : vector<16x64xf32>
    %108 = tpu.matmul %105, %107, %cst_27 {dimension_numbers = #tpu.dot_dimension_numbers<[1], [0], [0], [1], [0, 0, 1, 1], [], []>} : vector<16x32xbf16>, vector<32x64xbf16>, vector<16x64xf32> -> vector<16x64xf32>
    %c0_28 = arith.constant 0 : index
    %c0_29 = arith.constant 0 : index
    %c0_30 = arith.constant 0 : index
    %109 = vector.load %arg9[%c0_28, %c0_29, %c0_30] : memref<1x1x64xf32, #tpu.memory_space<vmem>>, vector<1x1x64xf32>
    %110 = vector.shape_cast %109 : vector<1x1x64xf32> to vector<1x64xf32>
    %111 = vector.broadcast %110 : vector<1x64xf32> to vector<16x64xf32>
    %112 = arith.addf %108, %111 : vector<16x64xf32>
    %cst_31 = arith.constant 0.000000e+00 : f32
    %113 = vector.broadcast %cst_31 : f32 to vector<16x64xf32>
    %114 = arith.maximumf %112, %113 : vector<16x64xf32>
    %115 = arith.truncf %114 : vector<16x64xf32> to vector<16x64xbf16>
    %c0_32 = arith.constant 0 : index
    %c0_33 = arith.constant 0 : index
    %c0_34 = arith.constant 0 : index
    %116 = vector.load %arg10[%c0_32, %c0_33, %c0_34] : memref<1x64x32xbf16, #tpu.memory_space<vmem>>, vector<1x64x32xbf16>
    %117 = vector.shape_cast %116 : vector<1x64x32xbf16> to vector<64x32xbf16>
    %cst_35 = arith.constant dense<0.000000e+00> : vector<16x32xf32>
    %118 = tpu.matmul %115, %117, %cst_35 {dimension_numbers = #tpu.dot_dimension_numbers<[1], [0], [0], [1], [0, 0, 1, 1], [], []>} : vector<16x64xbf16>, vector<64x32xbf16>, vector<16x32xf32> -> vector<16x32xf32>
    %119 = vector.broadcast %73 : vector<1x32xf32> to vector<16x32xf32>
    %120 = arith.addf %118, %119 : vector<16x32xf32>
    %121 = arith.addf %104, %120 : vector<16x32xf32>
    %cst_36 = arith.constant dense<0.000000e+00> : vector<16xf32>
    %122 = vector.multi_reduction <add>, %121, %cst_36 [1] : vector<16x32xf32> to vector<16xf32>
    %123 = vector.shape_cast %122 : vector<16xf32> to vector<16x1xf32>
    %cst_37 = arith.constant 3.200000e+01 : f32
    %124 = vector.broadcast %cst_37 : f32 to vector<16x1xf32>
    %125 = arith.divf %123, %124 : vector<16x1xf32>
    %126 = vector.broadcast %125 : vector<16x1xf32> to vector<16x32xf32>
    %127 = arith.subf %121, %126 : vector<16x32xf32>
    %128 = arith.mulf %127, %127 : vector<16x32xf32>
    %cst_38 = arith.constant dense<0.000000e+00> : vector<16xf32>
    %129 = vector.multi_reduction <add>, %128, %cst_38 [1] : vector<16x32xf32> to vector<16xf32>
    %130 = vector.shape_cast %129 : vector<16xf32> to vector<16x1xf32>
    %cst_39 = arith.constant 3.200000e+01 : f32
    %131 = vector.broadcast %cst_39 : f32 to vector<16x1xf32>
    %132 = arith.divf %130, %131 : vector<16x1xf32>
    %133 = vector.broadcast %125 : vector<16x1xf32> to vector<16x32xf32>
    %134 = arith.subf %121, %133 : vector<16x32xf32>
    %cst_40 = arith.constant 9.99999974E-6 : f32
    %135 = vector.broadcast %cst_40 : f32 to vector<16x1xf32>
    %136 = arith.addf %132, %135 : vector<16x1xf32>
    %137 = math.rsqrt %136 : vector<16x1xf32>
    %138 = vector.broadcast %137 : vector<16x1xf32> to vector<16x32xf32>
    %139 = arith.mulf %134, %138 : vector<16x32xf32>
    %140 = vector.broadcast %74 : vector<1x32xf32> to vector<16x32xf32>
    %141 = arith.mulf %139, %140 : vector<16x32xf32>
    %142 = vector.broadcast %75 : vector<1x32xf32> to vector<16x32xf32>
    %143 = arith.addf %141, %142 : vector<16x32xf32>
    %c0_41 = arith.constant 0 : index
    %c0_42 = arith.constant 0 : index
    %144 = vector.load %arg12[%c0_41, %c0_42] : memref<16x32xf32, #tpu.memory_space<vmem>>, vector<16x32xf32>
    tpu.vector_store %arg12[%c0_41, %c0_42], %143 {strides = array<i32>} : memref<16x32xf32, #tpu.memory_space<vmem>>, vector<16x32xf32>,
    %c1_i32 = arith.constant 1 : i32
    %145 = arith.cmpi eq, %arg1, %c1_i32 : i32
    %146 = arith.extui %145 : i1 to i32
    %c0_i32_43 = arith.constant 0 : i32
    %147 = arith.cmpi ne, %146, %c0_i32_43 : i32
    scf.if %147 {
      %148 = vector.shape_cast %143 : vector<16x32xf32> to vector<2x8x32xf32>
      %c0_44 = arith.constant 0 : index
      %c0_45 = arith.constant 0 : index
      %c0_46 = arith.constant 0 : index
      %149 = vector.load %arg11[%c0_44, %c0_45, %c0_46] : memref<2x8x32xf32, #tpu.memory_space<vmem>>, vector<2x8x32xf32>
      tpu.vector_store %arg11[%c0_44, %c0_45, %c0_46], %148 {strides = array<i32>} : memref<2x8x32xf32, #tpu.memory_space<vmem>>, vector<2x8x32xf32>,
    } else {
    }
    return
  }
  func.func @transform_0(%arg0: i32, %arg1: i32) -> (i32, i32) {
    %c0_i32 = arith.constant 0 : i32
    %c0_i32_0 = arith.constant 0 : i32
    %c0_i32_1 = arith.constant 0 : i32
    return %c0_i32, %c0_i32_0 : i32, i32
  }
  func.func @transform_1(%arg0: i32, %arg1: i32) -> (i32, i32, i32) {
    %c0_i32 = arith.constant 0 : i32
    %c0_i32_0 = arith.constant 0 : i32
    %c0_i32_1 = arith.constant 0 : i32
    return %arg0, %c0_i32, %c0_i32_0 : i32, i32, i32
  }
  func.func @transform_2(%arg0: i32, %arg1: i32) -> (i32, i32, i32) {
    %c0_i32 = arith.constant 0 : i32
    %c0_i32_0 = arith.constant 0 : i32
    %c0_i32_1 = arith.constant 0 : i32
    return %arg1, %c0_i32, %c0_i32_0 : i32, i32, i32
  }
  func.func @transform_3(%arg0: i32, %arg1: i32) -> (i32, i32, i32) {
    %c0_i32 = arith.constant 0 : i32
    %c0_i32_0 = arith.constant 0 : i32
    %c0_i32_1 = arith.constant 0 : i32
    return %arg1, %c0_i32, %c0_i32_0 : i32, i32, i32
  }
  func.func @transform_4(%arg0: i32, %arg1: i32) -> (i32, i32, i32) {
    %c0_i32 = arith.constant 0 : i32
    %c0_i32_0 = arith.constant 0 : i32
    %c0_i32_1 = arith.constant 0 : i32
    return %arg1, %c0_i32, %c0_i32_0 : i32, i32, i32
  }
  func.func @transform_5(%arg0: i32, %arg1: i32) -> (i32, i32, i32) {
    %c0_i32 = arith.constant 0 : i32
    %c0_i32_0 = arith.constant 0 : i32
    %c0_i32_1 = arith.constant 0 : i32
    return %arg1, %c0_i32, %c0_i32_0 : i32, i32, i32
  }
  func.func @transform_6(%arg0: i32, %arg1: i32) -> (i32, i32, i32) {
    %c0_i32 = arith.constant 0 : i32
    %c0_i32_0 = arith.constant 0 : i32
    %c0_i32_1 = arith.constant 0 : i32
    return %arg1, %c0_i32, %c0_i32_0 : i32, i32, i32
  }
  func.func @transform_7(%arg0: i32, %arg1: i32) -> (i32, i32, i32) {
    %c0_i32 = arith.constant 0 : i32
    %c0_i32_0 = arith.constant 0 : i32
    %c0_i32_1 = arith.constant 0 : i32
    return %arg1, %c0_i32, %c0_i32_0 : i32, i32, i32
  }
  func.func @transform_8(%arg0: i32, %arg1: i32) -> (i32, i32, i32) {
    %c0_i32 = arith.constant 0 : i32
    %c0_i32_0 = arith.constant 0 : i32
    %c0_i32_1 = arith.constant 0 : i32
    return %arg1, %c0_i32, %c0_i32_0 : i32, i32, i32
  }
  func.func @transform_9(%arg0: i32, %arg1: i32) -> (i32, i32, i32) {
    %c0_i32 = arith.constant 0 : i32
    %c0_i32_0 = arith.constant 0 : i32
    %c0_i32_1 = arith.constant 0 : i32
    return %arg0, %c0_i32, %c0_i32_0 : i32, i32, i32
  }
}

</mosaic_0001>

<bundles_post_ra>
// kernel: tpu_custom_call.1
= control target key start
LH: loop header
LB: loop body
LE: loop exit
PB: predicated region body
PF: predicated region fallthrough
CT: control target
= control target key end

     0   :  { %s2527_s0 = inlined_call_operand.hbm [shape: f32[8,32], index: 0, kind: input, shape index: {}]   ;;  %s2528_s1 = inlined_call_operand.vmem [shape: f32[4,8,32], index: 1, kind: input, shape index: {}]   ;;  %s2529_s2 = inlined_call_operand.vmem [shape: bf16[2,32,96], index: 2, kind: input, shape index: {}]   ;;  %s2530_s3 = inlined_call_operand.vmem [shape: f32[2,1,96], index: 3, kind: input, shape index: {}]   ;;  %s2531_s4 = inlined_call_operand.vmem [shape: bf16[2,32,32], index: 4, kind: input, shape index: {}]   ;;  %s2532_s5 = inlined_call_operand.vmem [shape: f32[2,6,32], index: 5, kind: input, shape index: {}]   ;;  %s2533_s6 = inlined_call_operand.hbm [shape: bf16[2,32,64], index: 6, kind: input, shape index: {}]   ;;  %s2534_s7 = inlined_call_operand.hbm [shape: f32[2,1,64], index: 7, kind: input, shape index: {}]   ;;  %s2535_s8 = inlined_call_operand.vmem [shape: bf16[2,64,32], index: 8, kind: input, shape index: {}]   ;;  %s2536_s9 = inlined_call_operand.hbm [shape: f32[4,8,32], index: 9, kind: output, shape index: {}]  }
   0x1   :  { %2549 = sst [smem:[#allocation24_spill]] %s2527_s0 }
   0x2   :  { %2550 = sst [smem:[#allocation25_spill]] %s2528_s1 }
   0x3   :  { %2551 = sst [smem:[#allocation26_spill]] %s2529_s2 }
   0x4   :  { %2552 = sst [smem:[#allocation27_spill]] %s2532_s5 }
   0x5   :  { %2553 = sst [smem:[#allocation28_spill]] %s2533_s6 }
   0x6   :  { %2554 = sst [smem:[#allocation29_spill]] %s2534_s7 }
   0x7   :  { %2555 = sst [smem:[#allocation30_spill]] %s2535_s8 }
   0x8   :  { %2556 = sst [smem:[#allocation31_spill]] %s2536_s9 }
   0x9   :  { %14 = vsyncpa [#allocation4], 0 }
   0xa   :  { %15 = vsyncpa [#allocation7], 0 }
   0xb   :  { %17 = vsyncpa [#allocation7 + $0x1], 0 }
   0xc   :  { %18 = vsyncpa [#allocation5], 0 }
   0xd   :  { %20 = vsyncpa [#allocation5 + $0x1], 0  ;;  %s2115_s30 = smov 0   ;;  %s2117_s10 = smov 0  }
   0xe   :  { %s2119_s11 = smov 0   ;;  %s2121_s12 = smov 0  }
   0xf   :  { %s2123_s13 = smov 0   ;;  %s2125_s14 = smov 0  }
  0x10   :  { %s2127_s15 = smov 0   ;;  %s2129_s16 = smov 0  }
  0x11   :  { %s2131_s17 = smov 0   ;;  %s2133_s18 = smov 0  }
  0x12   :  { %s2135_s19 = smov 0  }
  0x13 LB: > { %2557 = sst [smem:[#allocation13_spill]] %s2010_s30  ;;  %s35_s20 = sadd.s32 1, %s2042_s17  ;;  %s2050_s19 = sphi %s2135_s19, %s26_s19   ;;  %s2046_s18 = sphi %s2133_s18, %s2596_s18   ;;  %s2042_s17 = sphi %s2131_s17, %s2595_s17   ;;  %s2038_s16 = sphi %s2129_s16, %s2594_s16   ;;  %s2034_s15 = sphi %s2127_s15, %s2593_s15   ;;  %s2030_s14 = sphi %s2125_s14, %s2592_s14   ;;  %s2026_s13 = sphi %s2123_s13, %s2591_s13   ;;  %s2022_s12 = sphi %s2121_s12, %s2590_s12   ;;  %s2018_s11 = sphi %s2119_s11, %s2589_s11   ;;  %s2014_s10 = sphi %s2117_s10, %s2598_s10   ;;  %s2010_s30 = sphi %s2115_s30, %s2597_s30  }
  0x14   : > { %2558 = sst [smem:[#allocation14_spill]] %s2018_s11  ;;  %s38_s21 = sadd.s32 1, %s2046_s18 }
  0x15   : > { %2559 = sst [smem:[#allocation15_spill]] %s2026_s13  ;;  %p36_p0 = scmp.ge.s32.totalorder %s35_s20, 2 }
  0x16   : > { %2560 = sst [smem:[#allocation16_spill]] %s2030_s14  ;;  %s196_s22 = sadd.s32 1, %s2030_s14 }
  0x17   : > { %2561 = sst [smem:[#allocation17_spill]] %s2042_s17  ;;  %p203_p1 = scmp.ne.s32.totalorder %s2030_s14, %s2026_s13 }
  0x18   : > { %2562 = sst [smem:[#allocation18_spill]] %s2046_s18  ;;  %p204_p2 = scmp.eq.s32.totalorder %s2050_s19, 0 }
  0x19   : > { %s2600_s20 = smov (%p36_p0, %s35_s20), 0  ;;  %s2602_s21 = smov (!%p36_p0, %s38_s21), %s2046_s18 }
  0x1a   : > { %2563 = sst [smem:[#allocation19_spill]] %s2600_s20  ;;  %s193_s23 = ssub.s32 %s2042_s17, %s2600_s20 }
  0x1b   : > { %p2181_p3 = por %p204_p2, %p203_p1  ;;  %p40_p4 = scmp.ge.s32.totalorder %s2602_s21, 2 }
  0x1c   : > { %p194_p5 = scmp.eq.s32.totalorder %s193_s23, 0  ;;  %p1671_p6 = scmp.lt.s32.totalorder %s2050_s19, 4 }
  0x1d   : > { %s2604_s21 = smov (%p40_p4, %s2602_s21), 0  ;;  %s361_s26 = sand.u32 1, %s2050_s19  }
  0x1e   : > { %2565 = sst [smem:[#allocation20_spill]] %s2604_s21  ;;  %s2539_s27 = sand.u32 1, %s2030_s14  }
  0x1f   : > { %s2189_s25 = scalar_select %p194_p5, %s2030_s14, %s196_s22  }
  0x20   : > { %s1547_s28 = sshll.u32 %s2539_s27, 4  ;;  %s1630_s29 = sshll.u32 %s2042_s17, 4 }
  0x21   : > { %2566 = sst [smem:[#allocation21_spill]] %s2189_s25  ;;  %s365_s8 = scalar_lea.vmem [#allocation6], %s1547_s28 }
  0x22   : > { %s2567_s6 = sld [smem:[#allocation28_spill]]  ;;  %s373_s5 = sshll.u32 %s365_s8, 4  ;;  %s374_s5 = int_to_ptr.vmem [resolvable:$true] %s373_s5 }
  0x23   : > { %p2203_p7 = pnand %p1671_p6, %p2181_p3  ;;  %s2207_s9 = scalar_lea.sflag [#allocation7], %s361_s26 }
  0x24   : > { %s2052_s20 = smov 64   ;;  %s2053_s8 = smov 4  }
  0x25   : > { %s2213_s28 = sadd.s32 4294967295, %s2050_s19   ;;  %s1543_s24 = sadd.s32 4294967294, %s2050_s19  }
  0x26   : > { %p209_p8 = scmp.ne.s32.totalorder %s2026_s13, %s2022_s12  ;;  %p210_p9 = scmp.eq.s32.totalorder %s2213_s28, 0 }
  0x27   : > { %p284_p12 = scmp.ne.s32.totalorder %s2018_s11, %s2014_s10  ;;  %p285_p13 = scmp.eq.s32.totalorder %s2213_s28, 3 }
  0x28   : > { %s370_s23 = scalar_lea.hbm %s2567_s6, %s1630_s29  ;;  %s271_s29 = ssub.s32 %s2046_s18, %s2604_s21 }
  0x29   : > { %s371_s22 = sshll.u32 %s370_s23, 4  ;;  %p272_p10 = scmp.eq.s32.totalorder %s271_s29, 0  ;;  %s372_s22 = int_to_ptr.hbm [resolvable:$true] %s371_s22 }
  0x2a   : > { %1662 = dma.hbm_to_vmem [thread:$0]  (!%p2203_p7), %s372_s22, 256, %s374_s5, %s2207_s9, %s2052_s20, %s2052_s20, %s2053_s8  }
  0x2b   : > { %s274_s23 = sadd.s32 1, %s2018_s11  ;;  %p2224_p11 = por %p210_p9, %p209_p8 }
  0x2c   : > { %s2231_s5 = scalar_select %p272_p10, %s2018_s11, %s274_s23  }
  0x2d   : > { %p290_p0 = scmp.ne.s32.totalorder %s2014_s10, %s2010_s30  ;;  %p291_p1 = scmp.eq.s32.totalorder %s1543_s24, 3 }
  0x2e   : > { %2570 = sst [smem:[#allocation22_spill]] %s2231_s5  ;;  %p1544_p2 = scmp.ge.s32.totalorder %s2050_s19, 1 }
  0x2f   : > { %p2237_p3 = por %p285_p13, %p284_p12  ;;  %p298_p4 = scmp.lt.s32.totalorder %s2050_s19, 5 }
  0x30   : > { %p2242_p5 = por %p291_p1, %p290_p0  ;;  %s2575_s0 = sld [smem:[#allocation24_spill]] }
  0x31   : > { %p2246_p6 = pnand %p1544_p2, %p298_p4  ;;  %s2054_s23 = smov [#allocation3]  }
  0x32   : > { %s2572_s22 = scalar_select %p2242_p5, 1, 0 }
  0x33   : > { %p1655_p8 = pneg %p2246_p6  ;;  %s312_s6 = sshll.u32 %s2054_s23, 4  ;;  %s313_s6 = int_to_ptr.vmem [resolvable:$true] %s312_s6 }
  0x34   : > { %2573 = sst [smem:[#allocation23_spill]] %s2572_s22  ;;  %s2577_s11 = sand.u32 1, %s2030_s14  }
  0x35   : > { %p1656_p10 = pnand %p1655_p8, %p210_p9  ;;  %s2576_s7 = sld [smem:[#allocation29_spill]] }
  0x36   : > { %s310_s24 = sshll.u32 %s2575_s0, 4  ;;  %s386_s22 = scalar_lea.vmem [#allocation8], %s2577_s11  ;;  %s311_s24 = int_to_ptr.hbm [resolvable:$true] %s310_s24 }
  0x37   : > { %s393_s30 = sshll.u32 %s386_s22, 4  ;;  %s394_s30 = int_to_ptr.vmem [resolvable:$true] %s393_s30 }
  0x38   : > { %1658 = dma.hbm_to_vmem [thread:$0]  (!%p1656_p10), %s311_s24, 128, %s313_s6, [#allocation4]  }
  0x39   : > { %410 = sbr.rel (%p2246_p6) target bundleno = 2136 (0x858), region = 56 }
  0x3b   : > { %s389_s25 = scalar_lea.hbm %s2576_s7, %s2042_s17 }
  0x3c   : > { %s391_s5 = sshll.u32 %s389_s25, 4  ;;  %s392_s5 = int_to_ptr.hbm [resolvable:$true] %s391_s5 }
  0x3d   : > { %1665 = dma.hbm_to_vmem [thread:$0]  (!%p2203_p7), %s392_s5, 16, %s394_s30, %s2207_s9  }
  0x3e   : > { %1997 = dma.done.wait (%p210_p9), [#allocation4], 128  }
  0x3f   : > { %1999 = vsyncadd (%p210_p9), [#allocation4], 4294967168  ;;  %s417_s18 = sand.u32 1, %s2213_s28   ;;  %s419_s11 = sand.u32 1, %s2026_s13  }
  0x40   : > { %s2274_s21 = sshll.u32 %s419_s11, 4  ;;  %s418_s6 = scalar_lea.sflag [#allocation7], %s417_s18 }
  0x41   : > { %2001 = dma.done.wait (%p2224_p11), %s418_s6, 272  }
  0x42   : > { %2003 = vsyncadd (%p2224_p11), %s418_s6, 4294967024  ;;  %s2545_s30 = sand.u32 1, %s2014_s10   ;;  %s1554_s9 = sshll.u32 %s2038_s16, 1 }
  0x43   : > { %s1553_s27 = sshll.u32 %s2545_s30, 4  ;;  %p498_p7 = scmp.lt.s32.totalorder %s1554_s9, 3 }
  0x44   : > { %p503_p9 = scmp.lt.s32.totalorder %s2034_s15, 1  ;;  %s2578_s1 = sld [smem:[#allocation25_spill]] }
  0x45   : > { %s2606_s9 = smov (!%p498_p7, %s1554_s9), 3  ;;  %s2579_s2 = sld [smem:[#allocation26_spill]] }
  0x46   : > { %s2287_s28 = scalar_select %p503_p9, %s2034_s15, 1 }
  0x47   : > { %s1555_s26 = sshll.u32 %s2606_s9, 3  ;;  %s2580_s13 = sld [smem:[#allocation27_spill]] }
  0x48   : > { %s1631_s8 = sshll.u32 %s2287_s28, 4  ;;  %s510_s30 = scalar_lea.vmem %s2530_s3, %s2287_s28 }
  0x49   : > { %s2303_s7 = scalar_lea.vmem %s2531_s4, %s1631_s8  ;;  %s1560_s17 = sshll.u32 %s2287_s28, 3 }
  0x4a   : > { %s501_s20 = scalar_lea.vmem %s2578_s1, %s1555_s26  ;;  %s1633_s26 = sshll.u32 %s2287_s28, 5 }
  0x4b   : > { %s507_s23 = scalar_lea.vmem %s2579_s2, %s1631_s8  ;;  %s2581_s29 = sld [smem:[#allocation30_spill]] }
  0x4c   : > { %s2317_s2 = scalar_lea.vmem [#allocation8], %s419_s11  ;;  %s2319_s18 = scalar_lea.vmem [#allocation9], %s1553_s27 }
  0x4d   : > { %s2309_s5 = scalar_lea.vmem %s2580_s13, %s1560_s17  ;;  %p1563_p11 = scmp.ne.s32.totalorder %s2034_s15, 0 }
  0x4f   : > { %530 = sbr.rel (%p1563_p11) target bundleno = 89 (0x59), region = 72 }
  0x51   : > { %s2315_s24 = scalar_lea.vmem %s2581_s29, %s1633_s26 }
  0x54   : > { %v531_v0 = vld [vmem:[%s501_s20] sm:$0xff]  ;;  %v533_v1 = vld [vmem:[#allocation3] sm:$0xff]  ;;  %vm536_vm0 = vcmask 261120   ;;  %v532_v2 = vld [vmem:[%s501_s20 + $0x8] sm:$0xff] }
  0x55   : > { %v534_v3 = vadd.f32 %v533_v1, %v531_v0  ;;  %v535_v4 = vadd.f32 %v533_v1, %v532_v2 }
  0x57   : > { %537 = vst.msk [vmem:[#allocation2] sm:$0xff] %vm536_vm0, %v534_v3 }
  0x58   : > { %538 = vst.msk [vmem:[#allocation2 + $0x8] sm:$0xff] %vm536_vm0, %v535_v4 }
  0x59 PF: > { %v1635_v5 = vld [vmem:[%s507_s23 + $0x8] sm:$0xff]  ;;  %v1634_v6 = vld [vmem:[%s507_s23] sm:$0xff]  ;;  %vm562_vm1 = vcmask 261120   ;;  %s2055_s0 = smov 112   ;;  %s2056_s1 = smov 120   ;;  %vm613_vm2 = vcmask 64512  }
  0x5a   : > { %572 = vmatpush.bf16.msra.mxu0 %v1635_v5  ;;  %v1790_v10 = vld [vmem:[%s510_s30] ss:$0 sm:$0xff]  ;;  %s2057_s13 = smov 104   ;;  %s2058_s14 = smov 96   ;;  %vm902_vm3 = vcmask 1043456   ;;  %vm1092_vm4 = vcmask 130048  }
  0x5b   : > { %s2059_s17 = smov 64   ;;  %s2060_s11 = smov 8   ;;  %vm1095_vm5 = vcmask 195584   ;;  %vm1267_vm13 = vcmask 523264  }
  0x5c   : > { %s2061_s25 = smov 16   ;;  %s2062_s30 = smov 24  }
  0x5d   : > { %p1624_p12 = scmp.ne.s32.totalorder %s2034_s15, 1 }
  0x5e   : > { %v2322_v7 = vld [vmem:[#allocation2] sm:$0xff]  ;;  %573 = vmatpush.bf16.msra.mxu0 %v1634_v6 }
  0x5f   : > { %v2324_v8 = vld [vmem:[#allocation2 + $0x8] sm:$0xff] }
  0x60   : > { %v541_v9 = vpack.c.bf16 %v2324_v8, %v2322_v7 }
  0x62   : > { %1572 = vmatmul.msk.bf16.vlgmr.msra.gmra.mxu0 %vm562_vm1, %v541_v9 }
  0xdf   : > { %v575_v11 = vpop.f32.mrf.mxu0 }
  0xe0   : > { %v576_v12 = vadd.f32 %v1790_v10, %v575_v11 }
  0xe2   : > { %588 = vrot.lane.b32.xlu2 %v576_v12, %s2055_s0  ;;  %582 = vrot.lane.b32.xlu0 %v576_v12, %s2056_s1  ;;  %v600_v15 = vpack.c.bf16 %v576_v12, %v576_v12 }
  0xe4   : > { %v609_v17 = vunpack.c.l.b16 %v600_v15 }
  0xe6   : > { %v610_v19 = vpack.c.b16 %v609_v17, %v609_v17 }
  0xe7   : > { %v577_v13 = vpop.f32.mrf.mxu0 }
  0xe8   : > { %v578_v14 = vadd.f32 %v1790_v10, %v577_v13 }
  0xea   : > { %590 = vrot.lane.b32.xlu1 %v578_v14, %s2055_s0  ;;  %596 = vrot.lane.b32.xlu2 %v578_v14, %s2057_s13  ;;  %v601_v16 = vpack.c.bf16 %v578_v14, %v578_v14 }
  0xeb   : > { %584 = vrot.lane.b32.xlu0 %v578_v14, %s2056_s1 }
  0xec   : > { %v634_v18 = vunpack.c.l.b16 %v601_v16 }
  0xee   : > { %v635_v20 = vpack.c.b16 %v634_v18, %v634_v18 }
  0xf2   : > { %594 = vrot.lane.b32.xlu1 %v576_v12, %s2057_s13  ;;  %611 = vrot.lane.b32.xlu2 %v610_v19, %s2058_s14 }
  0xf3   : > { %636 = vrot.lane.b32.xlu0 %v635_v20, %s2058_s14 }
 0x13c   : > { %v589_v21 = vpop.permute.xlu2 %588 }
 0x13d   : > { %v604_v37 = vpack.c.bf16 %v589_v21, %v589_v21 }
 0x13f   : > { %v706_v43 = vunpack.c.l.b16 %v604_v37 }
 0x141   : > { %v2347_v48 = vpack.c.b16 %v706_v43, %v706_v43 }
 0x144   : > { %v597_v22 = vpop.permute.xlu2 %596 }
 0x145   : > { %v2334_v35 = vpack.c.bf16 %v597_v22, %v597_v22 }
 0x147   : > { %v778_v40 = vunpack.c.l.b16 %v2334_v35 }
 0x149   : > { %v2343_v46 = vpack.c.b16 %v778_v40, %v778_v40 }
 0x14c   : > { %v612_v23 = vpop.permute.xlu2 %611 }
 0x14d   : > { %v618_v24 = vsel %vm613_vm2, %v612_v23, 0 }
 0x14e   : > { %627 = vmatpush.bf16.xpose.msra.mxu1 %v618_v24 }
 0x154   : > { %v583_v25 = vpop.permute.xlu0 %582 }
 0x155   : > { %v602_v26 = vpack.c.bf16 %v583_v25, %v583_v25  ;;  %1573 = vmatmul.msk.bf16.vlgmr.msra.gmra.mxu1 %vm613_vm2, %v600_v15 }
 0x157   : > { %v658_v27 = vunpack.c.l.b16 %v602_v26 }
 0x159   : > { %v659_v28 = vpack.c.b16 %v658_v27, %v658_v27 }
 0x15b   : > { %660 = vrot.lane.b32.xlu1 %v659_v28, %s2058_s14 }
 0x15c   : > { %v591_v29 = vpop.permute.xlu1 %590 }
 0x15d   : > { %v605_v30 = vpack.c.bf16 %v591_v29, %v591_v29  ;;  %v585_v31 = vpop.permute.xlu0 %584 }
 0x15e   : > { %v603_v32 = vpack.c.bf16 %v585_v31, %v585_v31 }
 0x15f   : > { %v730_v33 = vunpack.c.l.b16 %v605_v30 }
 0x160   : > { %v682_v34 = vunpack.c.l.b16 %v603_v32 }
 0x161   : > { %v2336_v36 = vpack.c.b16 %v730_v33, %v730_v33 }
 0x162   : > { %v683_v38 = vpack.c.b16 %v682_v34, %v682_v34 }
 0x163   : > { %732 = vrot.lane.b32.xlu1 %v2336_v36, %s2058_s14 }
 0x164   : > { %684 = vrot.lane.b32.xlu0 %v683_v38, %s2058_s14  ;;  %v595_v39 = vpop.permute.xlu1 %594 }
 0x165   : > { %v606_v41 = vpack.c.bf16 %v595_v39, %v595_v39  ;;  %v637_v42 = vpop.permute.xlu0 %636 }
 0x166   : > { %v642_v44 = vsel %vm613_vm2, %v637_v42, 0 }
 0x167   : > { %v754_v45 = vunpack.c.l.b16 %v606_v41  ;;  %651 = vmatpush.bf16.xpose.msra.mxu2 %v642_v44 }
 0x169   : > { %v2345_v47 = vpack.c.b16 %v754_v45, %v754_v45 }
 0x16b   : > { %780 = vrot.lane.b32.xlu1 %v2343_v46, %s2058_s14  ;;  %756 = vrot.lane.b32.xlu2 %v2345_v47, %s2058_s14 }
 0x16c   : > { %708 = vrot.lane.b32.xlu0 %v2347_v48, %s2058_s14 }
 0x16e   : > { %1574 = vmatmul.msk.bf16.vlgmr.msra.gmra.mxu2 %vm613_vm2, %v601_v16 }
 0x173   : > { %919 = vrot.lane.b32.xlu1 %v635_v20, %s2059_s17  ;;  %940 = vrot.lane.b32.xlu2 %v659_v28, %s2059_s17 }
 0x174   : > { %897 = vrot.lane.b32.xlu0 %v610_v19, %s2059_s17 }
 0x1c5   : > { %v757_v49 = vpop.permute.xlu2 %756 }
 0x1c6   : > { %v762_v52 = vsel %vm613_vm2, %v757_v49, 0 }
 0x1cd   : > { %v661_v50 = vpop.permute.xlu1 %660  ;;  %v941_v54 = vpop.permute.xlu2 %940 }
 0x1ce   : > { %v666_v51 = vsel %vm613_vm2, %v661_v50, 0  ;;  %v946_v57 = vsel %vm902_vm3, %v941_v54, 0 }
 0x1cf   : > { %675 = vmatpush.bf16.xpose.msra.mxu3 %v666_v51 }
 0x1d2   : > { %v629_v53 = vpop.f32.mrf.mxu1 }
 0x1d3   : > { %v801_v55 = vsel %vm613_vm2, %v629_v53, -inf }
 0x1d4   : > { %802 = vmax.xlane.f32.xlu1 %v801_v55 }
 0x1d5   : > { %v733_v56 = vpop.permute.xlu1 %732 }
 0x1d6   : > { %v685_v58 = vpop.permute.xlu0 %684  ;;  %1575 = vmatmul.msk.bf16.vlgmr.msra.gmra.mxu3 %vm613_vm2, %v602_v26  ;;  %v738_v59 = vsel %vm613_vm2, %v733_v56, 0 }
 0x1d7   : > { %771 = vmatpush.bf16.xpose.msrb.mxu3 %v762_v52  ;;  %v690_v60 = vsel %vm613_vm2, %v685_v58, 0  ;;  %747 = vmatpush.bf16.xpose.msrb.mxu2 %v738_v59 }
 0x1d8   : > { %699 = vmatpush.bf16.xpose.msrb.mxu0 %v690_v60 }
 0x1da   : > { %v631_v61 = vpop.f32.mrf.mxu1 }
 0x1dd   : > { %v781_v62 = vpop.permute.xlu1 %780 }
 0x1de   : > { %v786_v63 = vsel %vm613_vm2, %v781_v62, 0  ;;  %v709_v0 = vpop.permute.xlu0 %708  ;;  %1578 = vmatmul.msk.bf16.vlgmr.msrb.gmra.mxu2 %vm613_vm2, %v605_v30 }
 0x1df   : > { %955 = vmatpush.bf16.msra.mxu3 %v946_v57  ;;  %1576 = vmatmul.msk.bf16.vlgmr.msrb.gmra.mxu0 %vm613_vm2, %v603_v32  ;;  %v714_v1 = vsel %vm613_vm2, %v709_v0, 0 }
 0x1e0   : > { %723 = vmatpush.bf16.xpose.msrb.mxu1 %v714_v1  ;;  %795 = vmatpush.bf16.xpose.msra.mxu0 %v786_v63 }
 0x1e5   : > { %v920_v2 = vpop.permute.xlu1 %919 }
 0x1e6   : > { %v925_v3 = vsel %vm902_vm3, %v920_v2, 0  ;;  %v898_v4 = vpop.permute.xlu0 %897  ;;  %1579 = vmatmul.msk.bf16.vlgmr.msrb.gmra.mxu3 %vm613_vm2, %v606_v41 }
 0x1e7   : > { %v904_v5 = vsel %vm902_vm3, %v898_v4, 0  ;;  %1577 = vmatmul.msk.bf16.vlgmr.msrb.gmra.mxu1 %vm613_vm2, %v604_v37  ;;  %934 = vmatpush.bf16.msra.mxu2 %v925_v3 }
 0x1e8   : > { %913 = vmatpush.bf16.msra.mxu1 %v904_v5 }
 0x1ed   : > { %961 = vrot.lane.b32.xlu1 %v683_v38, %s2059_s17 }
 0x1ef   : > { %1580 = vmatmul.msk.bf16.vlgmr.msra.gmra.mxu0 %vm613_vm2, %v2334_v35 }
 0x1f1   : > { %v653_v6 = vpop.f32.mrf.mxu2 }
 0x1f2   : > { %v804_v9 = vsel %vm613_vm2, %v653_v6, -inf }
 0x1f3   : > { %805 = vmax.xlane.f32.xlu2 %v804_v9 }
 0x1f9   : > { %v655_v10 = vpop.f32.mrf.mxu2 }
 0x247   : > { %v803_v11 = vpop.xlane.xlu1 %802 }
 0x248   : > { %v825_v12 = vsub.f32 %v629_v53, %v803_v11 }
 0x24a   : > { %v833_v13 = vmul.f32 1.442695, %v825_v12 }
 0x24c   : > { %1792 = vpow2.f32 %v833_v13 }
 0x252   : > { %v1793_v22 = vpop.eup %1792 }
 0x253   : > { %v849_v25 = vsel %vm613_vm2, %v1793_v22, 0.0 }
 0x259   : > { %v677_v14 = vpop.f32.mrf.mxu3 }
 0x25a   : > { %v807_v15 = vsel %vm613_vm2, %v677_v14, -inf }
 0x25b   : > { %808 = vmax.xlane.f32.xlu0 %v807_v15 }
 0x25c   : > { %v701_v16 = vpop.f32.mrf.mxu0 }
 0x25d   : > { %v810_v17 = vsel %vm613_vm2, %v701_v16, -inf }
 0x25e   : > { %811 = vmax.xlane.f32.xlu2 %v810_v17 }
 0x25f   : > { %v962_v18 = vpop.permute.xlu1 %961 }
 0x260   : > { %v967_v19 = vsel %vm902_vm3, %v962_v18, 0 }
 0x261   : > { %v679_v20 = vpop.f32.mrf.mxu3  ;;  %v749_v21 = vpop.f32.mrf.mxu2  ;;  %976 = vmatpush.bf16.msrb.mxu0 %v967_v19 }
 0x262   : > { %v816_v35 = vsel %vm613_vm2, %v749_v21, -inf }
 0x264   : > { %v703_v23 = vpop.f32.mrf.mxu0  ;;  %v725_v24 = vpop.f32.mrf.mxu1 }
 0x265   : > { %v813_v26 = vsel %vm613_vm2, %v725_v24, -inf }
 0x266   : > { %850 = vadd.xlane.f32.xlu2 %v849_v25  ;;  %814 = vmax.xlane.f32.xlu1 %v813_v26  ;;  %v806_v27 = vpop.xlane.xlu2 %805 }
 0x267   : > { %v826_v28 = vsub.f32 %v653_v6, %v806_v27 }
 0x269   : > { %v835_v29 = vmul.f32 1.442695, %v826_v28  ;;  %v751_v30 = vpop.f32.mrf.mxu2  ;;  %v773_v31 = vpop.f32.mrf.mxu3 }
 0x26a   : > { %v819_v32 = vsel %vm613_vm2, %v773_v31, -inf }
 0x26b   : > { %1794 = vpow2.f32 %v835_v29  ;;  %820 = vmax.xlane.f32.xlu0 %v819_v32 }
 0x26c   : > { %v727_v33 = vpop.f32.mrf.mxu1  ;;  %v797_v34 = vpop.f32.mrf.mxu0 }
 0x26d   : > { %v822_v41 = vsel %vm613_vm2, %v797_v34, -inf }
 0x26e   : > { %817 = vmax.xlane.f32.xlu2 %v816_v35 }
 0x271   : > { %v1795_v37 = vpop.eup %1794  ;;  %v775_v38 = vpop.f32.mrf.mxu3 }
 0x272   : > { %v852_v39 = vsel %vm613_vm2, %v1795_v37, 0.0 }
 0x273   : > { %853 = vadd.xlane.f32.xlu0 %v852_v39 }
 0x274   : > { %v799_v40 = vpop.f32.mrf.mxu0 }
 0x276   : > { %823 = vmax.xlane.f32.xlu2 %v822_v41 }
 0x28e   : > { %1003 = vrot.lane.b32.xlu2 %v2336_v36, %s2059_s17 }
 0x2ce   : > { %v809_v45 = vpop.xlane.xlu0 %808 }
 0x2cf   : > { %v827_v53 = vsub.f32 %v677_v14, %v809_v45 }
 0x2d1   : > { %v812_v42 = vpop.xlane.xlu2 %811  ;;  %v837_v36 = vmul.f32 1.442695, %v827_v53 }
 0x2d2   : > { %v828_v43 = vsub.f32 %v701_v16, %v812_v42 }
 0x2d4   : > { %v839_v44 = vmul.f32 1.442695, %v828_v43 }
 0x2d6   : > { %1796 = vpow2.f32 %v839_v44 }
 0x2d9   : > { %v815_v49 = vpop.xlane.xlu1 %814  ;;  %v851_v50 = vpop.xlane.xlu2 %850 }
 0x2da   : > { %v829_v51 = vsub.f32 %v725_v24, %v815_v49  ;;  %1798 = vrcp.f32 %v851_v50 }
 0x2dc   : > { %v1797_v52 = vpop.eup %1796  ;;  %v841_v54 = vmul.f32 1.442695, %v829_v51 }
 0x2dd   : > { %v858_v55 = vsel %vm613_vm2, %v1797_v52, 0.0 }
 0x2de   : > { %1800 = vpow2.f32 %v841_v54  ;;  %859 = vadd.xlane.f32.xlu0 %v858_v55  ;;  %v821_v56 = vpop.xlane.xlu0 %820 }
 0x2df   : > { %v831_v57 = vsub.f32 %v773_v31, %v821_v56 }
 0x2e0   : > { %v1799_v58 = vpop.eup %1798 }
 0x2e1   : > { %v881_v59 = vmul.f32 %v1799_v58, %v1793_v22  ;;  %v845_v60 = vmul.f32 1.442695, %v831_v57  ;;  %v818_v61 = vpop.xlane.xlu2 %817 }
 0x2e2   : > { %v830_v62 = vsub.f32 %v749_v21, %v818_v61 }
 0x2e3   : > { %v889_v63 = vpack.c.bf16 %v881_v59, %v881_v59  ;;  %1802 = vpow2.f32 %v845_v60 }
 0x2e4   : > { %v2390_v0 = vpop.eup %1800  ;;  %1804 = vpow2.f32 %v837_v36  ;;  %v843_v1 = vmul.f32 1.442695, %v830_v62 }
 0x2e5   : > { %1581 = vmatmul.msk.bf16.vlgmr.msra.gmra.mxu1 %vm613_vm2, %v889_v63  ;;  %v861_v2 = vsel %vm613_vm2, %v2390_v0, 0.0 }
 0x2e6   : > { %1806 = vpow2.f32 %v843_v1  ;;  %862 = vadd.xlane.f32.xlu1 %v861_v2  ;;  %v854_v3 = vpop.xlane.xlu0 %853 }
 0x2e7   : > { %1808 = vrcp.f32 %v854_v3 }
 0x2e9   : > { %v1803_v4 = vpop.eup %1802  ;;  %v824_v5 = vpop.xlane.xlu2 %823 }
 0x2ea   : > { %v1805_v6 = vpop.eup %1804  ;;  %v832_v9 = vsub.f32 %v797_v34, %v824_v5  ;;  %v867_v10 = vsel %vm613_vm2, %v1803_v4, 0.0 }
 0x2eb   : > { %868 = vadd.xlane.f32.xlu2 %v867_v10  ;;  %v855_v14 = vsel %vm613_vm2, %v1805_v6, 0.0  ;;  %v1636_v10 = vld [vmem:[%s2303_s7] sm:$0xff] }
 0x2ec   : > { %v1807_v11 = vpop.eup %1806  ;;  %v847_v12 = vmul.f32 1.442695, %v832_v9  ;;  %v1637_v9 = vld [vmem:[%s2303_s7 + $0x8] sm:$0xff]  ;;  %s2582_s7 = scalar_lea.vmem [#allocation6], %s2274_s21 }
 0x2ed   : > { %v1809_v13 = vpop.eup %1808  ;;  %v864_v15 = vsel %vm613_vm2, %v1807_v11, 0.0  ;;  %s2583_s27 = smov %s2582_s7 }
 0x2ee   : > { %v882_v16 = vmul.f32 %v1809_v13, %v1795_v37  ;;  %1810 = vpow2.f32 %v847_v12  ;;  %856 = vadd.xlane.f32.xlu1 %v855_v14  ;;  %865 = vadd.xlane.f32.xlu0 %v864_v15 }
 0x2f0   : > { %v890_v17 = vpack.c.bf16 %v882_v16, %v882_v16 }
 0x2f1   : > { %v1004_v18 = vpop.permute.xlu2 %1003 }
 0x2f2   : > { %v1009_v19 = vsel %vm902_vm3, %v1004_v18, 0  ;;  %1582 = vmatmul.msk.bf16.vlgmr.msra.gmra.mxu2 %vm613_vm2, %v890_v17 }
 0x2f3   : > { %1018 = vmatpush.bf16.msrb.mxu2 %v1009_v19 }
 0x2f4   : > { %v1811_v20 = vpop.eup %1810 }
 0x2f5   : > { %v870_v21 = vsel %vm613_vm2, %v1811_v20, 0.0 }
 0x2f6   : > { %871 = vadd.xlane.f32.xlu0 %v870_v21 }
 0x303   : > { %1045 = vrot.lane.b32.xlu2 %v2343_v46, %s2059_s17 }
 0x307   : > { %1024 = vrot.lane.b32.xlu1 %v2345_v47, %s2059_s17 }
 0x30a   : > { %982 = vrot.lane.b32.xlu0 %v2347_v48, %s2059_s17 }
 0x351   : > { %v860_v22 = vpop.xlane.xlu0 %859 }
 0x352   : > { %1812 = vrcp.f32 %v860_v22 }
 0x358   : > { %v1813_v23 = vpop.eup %1812 }
 0x359   : > { %v884_v24 = vmul.f32 %v1813_v23, %v1797_v52  ;;  %v863_v25 = vpop.xlane.xlu1 %862 }
 0x35b   : > { %v892_v26 = vpack.c.bf16 %v884_v24, %v884_v24 }
 0x35d   : > { %1584 = vmatmul.msk.bf16.vlgmr.msrb.gmra.mxu0 %vm613_vm2, %v892_v26 }
 0x35e   : > { %v869_v27 = vpop.xlane.xlu2 %868 }
 0x361   : > { %v857_v28 = vpop.xlane.xlu1 %856  ;;  %v866_v29 = vpop.xlane.xlu0 %865 }
 0x362   : > { %1814 = vrcp.f32 %v857_v28  ;;  %v2408_v30 = vpop.f32.mrf.mxu1 }
 0x363   : > { %1816 = vrcp.f32 %v866_v29 }
 0x366   : > { %v1046_v46 = vpop.permute.xlu2 %1045 }
 0x367   : > { %v1051_v47 = vsel %vm902_vm3, %v1046_v46, 0 }
 0x368   : > { %v1815_v31 = vpop.eup %1814  ;;  %1060 = vmatpush.bf16.msra.mxu0 %v1051_v47 }
 0x369   : > { %v1817_v48 = vpop.eup %1816  ;;  %v883_v32 = vmul.f32 %v1815_v31, %v1805_v6  ;;  %v872_v33 = vpop.xlane.xlu0 %871 }
 0x36a   : > { %v886_v34 = vmul.f32 %v1817_v48, %v1807_v11  ;;  %1818 = vrcp.f32 %v872_v33  ;;  %v917_v35 = vpop.f32.mrf.mxu1 }
 0x36b   : > { %v891_v37 = vpack.c.bf16 %v883_v32, %v883_v32  ;;  %1820 = vrcp.f32 %v869_v27  ;;  %v2427_v27 = vld [vmem:[%s2309_s5] sm:$0x3f] }
 0x36c   : > { %v894_v38 = vpack.c.bf16 %v886_v34, %v886_v34  ;;  %1822 = vrcp.f32 %v863_v25  ;;  %v1104_v28 = vperm.slane %v2427_v27, 0  ;;  %v2063_v34 = vmov 32.0  }
 0x36d   : > { %1583 = vmatmul.msk.bf16.vlgmr.msra.gmra.mxu3 %vm613_vm2, %v891_v37  ;;  %1824 = vrcp.f32 %v2063_v34 }
 0x36e   : > { %1586 = vmatmul.msk.bf16.vlgmr.msrb.gmra.mxu2 %vm613_vm2, %v894_v38 }
 0x370   : > { %v1819_v39 = vpop.eup %1818 }
 0x371   : > { %v888_v40 = vmul.f32 %v1819_v39, %v1811_v20  ;;  %v1821_v42 = vpop.eup %1820 }
 0x372   : > { %v1823_v44 = vpop.eup %1822  ;;  %v887_v45 = vmul.f32 %v1821_v42, %v1803_v4 }
 0x373   : > { %v896_v41 = vpack.c.bf16 %v888_v40, %v888_v40  ;;  %v885_v51 = vmul.f32 %v1823_v44, %v2390_v0  ;;  %v1825_v35 = vpop.eup %1824 }
 0x374   : > { %v895_v52 = vpack.c.bf16 %v887_v45, %v887_v45  ;;  %v1143_v37 = vmul.f32 32.0, %v1825_v35  ;;  %vm1147_vm6 = vweird.f32 %v1825_v35 }
 0x375   : > { %1588 = vmatmul.msk.bf16.vlgmr.msra.gmra.mxu0 %vm613_vm2, %v896_v41  ;;  %v936_v43 = vpop.f32.mrf.mxu2  ;;  %v893_v56 = vpack.c.bf16 %v885_v51, %v885_v51 }
 0x376   : > { %v1144_v38 = vsub.f32 1.0, %v1143_v37 }
 0x378   : > { %v1145_v39 = vmul.f32 %v1825_v35, %v1144_v38 }
 0x379   : > { %v1025_v49 = vpop.permute.xlu1 %1024 }
 0x37a   : > { %v1030_v50 = vsel %vm902_vm3, %v1025_v49, 0  ;;  %v1146_v40 = vadd.f32 %v1825_v35, %v1145_v39 }
 0x37b   : > { %1039 = vmatpush.bf16.msrb.mxu3 %v1030_v50 }
 0x37c   : > { %v983_v53 = vpop.permute.xlu0 %982 }
 0x37d   : > { %v988_v54 = vsel %vm902_vm3, %v983_v53, 0  ;;  %v938_v55 = vpop.f32.mrf.mxu2  ;;  %v1639_v53 = vld [vmem:[%s2582_s7 + $0x8] sm:$0xff] }
 0x37e   : > { %997 = vmatpush.bf16.msrb.mxu1 %v988_v54  ;;  %1587 = vmatmul.msk.bf16.vlgmr.msrb.gmra.mxu3 %vm613_vm2, %v895_v52 }
 0x37f   : > { %1223 = vmatpush.bf16.msra.mxu2 %v1639_v53 }
 0x381   : > { %1585 = vmatmul.msk.bf16.vlgmr.msrb.gmra.mxu1 %vm613_vm2, %v893_v56 }
 0x382   : > { %1126 = vmatpush.bf16.msra.mxu1 %v1637_v9 }
 0x386   : > { %1127 = vmatpush.bf16.msra.mxu1 %v1636_v10  ;;  %v1187_v10 = vperm.slane %v2427_v27, 1 }
 0x3da   : > { %v978_v57 = vpop.f32.mrf.mxu0 }
 0x3e2   : > { %v980_v58 = vpop.f32.mrf.mxu0 }
 0x3f0   : > { %v957_v36 = vpop.f32.mrf.mxu3 }
 0x3f1   : > { %v1775_v59 = vpack.i.bf16 %v978_v57, %v957_v36  ;;  %v1020_v60 = vpop.f32.mrf.mxu2  ;;  %v1638_v57 = vld [vmem:[%s2583_s27] sm:$0xff] }
 0x3f2   : > { %v1062_v61 = vpop.f32.mrf.mxu0  ;;  %1224 = vmatpush.bf16.msra.mxu2 %v1638_v57 }
 0x3f3   : > { %1776 = vrot.lane.b32.xlu0 %v1775_v59, %s2060_s11 }
 0x3f8   : > { %v959_v62 = vpop.f32.mrf.mxu3 }
 0x3f9   : > { %v1022_v63 = vpop.f32.mrf.mxu2 }
 0x3fa   : > { %v1064_v0 = vpop.f32.mrf.mxu0 }
 0x3fe   : > { %v999_v1 = vpop.f32.mrf.mxu1 }
 0x3ff   : > { %v1780_v2 = vpack.i.bf16 %v1020_v60, %v999_v1 }
 0x401   : > { %1781 = vrot.lane.b32.xlu1 %v1780_v2, %s2061_s25  ;;  %v1041_v3 = vpop.f32.mrf.mxu3 }
 0x402   : > { %v1785_v4 = vpack.i.bf16 %v1062_v61, %v1041_v3 }
 0x404   : > { %1786 = vrot.lane.b32.xlu2 %v1785_v4, %s2062_s30 }
 0x406   : > { %v1001_v5 = vpop.f32.mrf.mxu1 }
 0x409   : > { %v1043_v6 = vpop.f32.mrf.mxu3 }
 0x45e   : > { %v1787_v14 = vpop.permute.xlu2 %1786 }
 0x45f   : > { %v1789_v18 = vunpack.i.h.bf16 %v1787_v14  ;;  %v1788_v19 = vunpack.i.l.bf16 %v1787_v14  ;;  %v1190_v14 = vperm.slane %v2427_v27, 2 }
 0x465   : > { %v1777_v11 = vpop.permute.xlu0 %1776 }
 0x466   : > { %v1779_v12 = vunpack.i.h.bf16 %v1777_v11  ;;  %v1778_v13 = vunpack.i.l.bf16 %v1777_v11 }
 0x468   : > { %v1091_v20 = vsel %vm613_vm2, %v936_v43, %v1779_v12  ;;  %v1090_v21 = vsel %vm613_vm2, %v2408_v30, %v1778_v13 }
 0x473   : > { %v1782_v15 = vpop.permute.xlu1 %1781 }
 0x474   : > { %v1784_v16 = vunpack.i.h.bf16 %v1782_v15  ;;  %v1783_v17 = vunpack.i.l.bf16 %v1782_v15 }
 0x476   : > { %v1094_v22 = vsel %vm1092_vm4, %v1091_v20, %v1784_v16  ;;  %v1093_v23 = vsel %vm1092_vm4, %v1090_v21, %v1783_v17  ;;  %v1643_v21 = vld [vmem:[%s2315_s24 + $0x18] sm:$0xff] }
 0x477   : > { %v1096_v24 = vsel %vm1095_vm5, %v1093_v23, %v1788_v19  ;;  %v1097_v25 = vsel %vm1095_vm5, %v1094_v22, %v1789_v18  ;;  %1275 = vmatpush.bf16.msra.mxu3 %v1643_v21  ;;  %v1642_v22 = vld [vmem:[%s2315_s24 + $0x10] sm:$0xff]  ;;  %v1641_v23 = vld [vmem:[%s2315_s24 + $0x8] sm:$0xff] }
 0x478   : > { %v1099_v26 = vpack.c.bf16 %v1097_v25, %v1096_v24  ;;  %v1640_v24 = vld [vmem:[%s2315_s24] sm:$0xff] }
 0x47a   : > { %1597 = vmatmul.msk.bf16.vlgmr.msra.gmra.mxu1 %vm562_vm1, %v1099_v26  ;;  %v1791_v26 = vld [vmem:[%s2317_s2] ss:$0 sm:$0xff] }
 0x47b   : > { %1276 = vmatpush.bf16.msra.mxu3 %v1642_v22 }
 0x47f   : > { %1277 = vmatpush.bf16.msra.mxu3 %v1641_v23 }
 0x483   : > { %1278 = vmatpush.bf16.msra.mxu3 %v1640_v24 }
 0x4f7   : > { %v1129_v29 = vpop.f32.mrf.mxu1 }
 0x4f8   : > { %v1130_v46 = vadd.f32 %v1129_v29, %v1104_v28 }
 0x4fa   : > { %v1134_v47 = vadd.f32 %v1130_v46, %v2322_v7  ;;  %v2434_v7 = vsel %vm1147_vm6, %v1825_v35, %v1146_v40 }
 0x4fc   : > { %v1136_v31 = vsel %vm562_vm1, %v1134_v47, 0.0 }
 0x4fd   : > { %1137 = vadd.xlane.f32.xlu0 %v1136_v31 }
 0x4ff   : > { %v1131_v48 = vpop.f32.mrf.mxu1 }
 0x500   : > { %v1132_v30 = vadd.f32 %v1131_v48, %v1104_v28 }
 0x502   : > { %v1135_v32 = vadd.f32 %v1132_v30, %v2324_v8  ;;  %v1242_v30 = vperm.slane %v2427_v27, 3 }
 0x504   : > { %v1139_v33 = vsel %vm562_vm1, %v1135_v32, 0.0 }
 0x505   : > { %1140 = vadd.xlane.f32.xlu1 %v1139_v33 }
 0x570   : > { %v1138_v41 = vpop.xlane.xlu0 %1137 }
 0x571   : > { %v1149_v42 = vmul.f32 %v2434_v7, %v1138_v41 }
 0x573   : > { %v1151_v43 = vsub.f32 %v1134_v47, %v1149_v42 }
 0x575   : > { %v1153_v8 = vmul.f32 %v1151_v43, %v1151_v43 }
 0x577   : > { %v1155_v44 = vsel %vm562_vm1, %v1153_v8, 0.0 }
 0x578   : > { %v1141_v45 = vpop.xlane.xlu1 %1140  ;;  %1156 = vadd.xlane.f32.xlu2 %v1155_v44 }
 0x579   : > { %v1150_v49 = vmul.f32 %v2434_v7, %v1141_v45 }
 0x57b   : > { %v1152_v50 = vsub.f32 %v1135_v32, %v1150_v49 }
 0x57d   : > { %v1154_v51 = vmul.f32 %v1152_v50, %v1152_v50 }
 0x57f   : > { %v1158_v52 = vsel %vm562_vm1, %v1154_v51, 0.0 }
 0x580   : > { %1159 = vadd.xlane.f32.xlu0 %v1158_v52 }
 0x5eb   : > { %v1157_v54 = vpop.xlane.xlu2 %1156 }
 0x5ec   : > { %v1161_v55 = vmul.f32 %v1157_v54, %v2434_v7 }
 0x5ee   : > { %v1163_v56 = vadd.f32 1e-05, %v1161_v55 }
 0x5f0   : > { %1826 = vrsqrt.f32 %v1163_v56  ;;  %vm1171_vm8 = vweird.f32 %v1163_v56 }
 0x5f3   : > { %v1160_v58 = vpop.xlane.xlu0 %1159 }
 0x5f4   : > { %v1162_v36 = vmul.f32 %v1160_v58, %v2434_v7 }
 0x5f6   : > { %v1827_v59 = vpop.eup %1826  ;;  %v1164_v60 = vadd.f32 1e-05, %v1162_v36 }
 0x5f7   : > { %v1166_v61 = vmul.f32 %v1827_v59, %v1163_v56  ;;  %vm1172_vm7 = vweird.f32 %v1827_v59 }
 0x5f8   : > { %1828 = vrsqrt.f32 %v1164_v60  ;;  %vm1173_vm9 = vmor %vm1171_vm8, %vm1172_vm7  ;;  %vm1181_vm11 = vweird.f32 %v1164_v60 }
 0x5f9   : > { %v1167_v62 = vmul.f32 %v1827_v59, %v1166_v61 }
 0x5fb   : > { %v1168_v63 = vmul.f32 0.5, %v1167_v62 }
 0x5fd   : > { %v1169_v0 = vsub.f32 1.5, %v1168_v63 }
 0x5fe   : > { %v1829_v1 = vpop.eup %1828 }
 0x5ff   : > { %v1170_v2 = vmul.f32 %v1827_v59, %v1169_v0  ;;  %v1176_v3 = vmul.f32 %v1829_v1, %v1164_v60  ;;  %vm1182_vm10 = vweird.f32 %v1829_v1 }
 0x600   : > { %vm1183_vm12 = vmor %vm1181_vm11, %vm1182_vm10 }
 0x601   : > { %v1177_v4 = vmul.f32 %v1829_v1, %v1176_v3  ;;  %v1174_v5 = vsel %vm1173_vm9, %v1827_v59, %v1170_v2  ;;  %v1331_v2 = vperm.slane %v2427_v27, 4 }
 0x602   : > { %v1185_v11 = vmul.f32 %v1174_v5, %v1151_v43  ;;  %v1334_v5 = vperm.slane %v2427_v27, 5 }
 0x603   : > { %v1178_v6 = vmul.f32 0.5, %v1177_v4 }
 0x604   : > { %v1188_v15 = vmul.f32 %v1187_v10, %v1185_v11 }
 0x605   : > { %v1179_v9 = vsub.f32 1.5, %v1178_v6 }
 0x606   : > { %v1191_v18 = vadd.f32 %v1190_v14, %v1188_v15 }
 0x607   : > { %v1180_v12 = vmul.f32 %v1829_v1, %v1179_v9 }
 0x609   : > { %v1184_v13 = vsel %vm1183_vm12, %v1829_v1, %v1180_v12 }
 0x60a   : > { %v1186_v16 = vmul.f32 %v1184_v13, %v1152_v50 }
 0x60c   : > { %v1189_v17 = vmul.f32 %v1187_v10, %v1186_v16 }
 0x60e   : > { %v1192_v19 = vadd.f32 %v1190_v14, %v1189_v17 }
 0x610   : > { %v1193_v20 = vpack.c.bf16 %v1192_v19, %v1191_v18 }
 0x612   : > { %1606 = vmatmul.msk.bf16.vlgmr.msra.gmra.mxu2 %vm562_vm1, %v1193_v20 }
 0x695   : > { %v1226_v25 = vpop.f32.mrf.mxu2 }
 0x696   : > { %v1227_v28 = vadd.f32 %v1791_v26, %v1226_v25 }
 0x698   : > { %v1231_v47 = vmax.f32 %v1227_v28, 0.0 }
 0x69d   : > { %v1228_v29 = vpop.f32.mrf.mxu2 }
 0x69e   : > { %v1229_v46 = vadd.f32 %v1791_v26, %v1228_v29 }
 0x6a0   : > { %v1232_v31 = vmax.f32 %v1229_v46, 0.0 }
 0x6a2   : > { %v1233_v48 = vpack.c.bf16 %v1232_v31, %v1231_v47 }
 0x6a4   : > { %1623 = vmatmul.msk.bf16.vlgmr.msra.gmra.mxu3 %vm1267_vm13, %v1233_v48 }
 0x727   : > { %v1280_v32 = vpop.f32.mrf.mxu3 }
 0x728   : > { %v1281_v33 = vadd.f32 %v1280_v32, %v1242_v30 }
 0x72a   : > { %v1285_v34 = vadd.f32 %v1281_v33, %v1191_v18 }
 0x72c   : > { %v1287_v35 = vsel %vm562_vm1, %v1285_v34, 0.0 }
 0x72d   : > { %1288 = vadd.xlane.f32.xlu1 %v1287_v35 }
 0x72f   : > { %v1282_v37 = vpop.f32.mrf.mxu3 }
 0x730   : > { %v1283_v38 = vadd.f32 %v1282_v37, %v1242_v30 }
 0x732   : > { %v1286_v39 = vadd.f32 %v1283_v38, %v1192_v19 }
 0x734   : > { %v1290_v40 = vsel %vm562_vm1, %v1286_v39, 0.0 }
 0x735   : > { %1291 = vadd.xlane.f32.xlu2 %v1290_v40 }
 0x7a0   : > { %v1289_v41 = vpop.xlane.xlu1 %1288 }
 0x7a1   : > { %v1293_v42 = vmul.f32 %v1289_v41, %v2434_v7 }
 0x7a3   : > { %v1295_v43 = vsub.f32 %v1285_v34, %v1293_v42 }
 0x7a5   : > { %v1297_v8 = vmul.f32 %v1295_v43, %v1295_v43 }
 0x7a7   : > { %v1299_v44 = vsel %vm562_vm1, %v1297_v8, 0.0 }
 0x7a8   : > { %v1292_v45 = vpop.xlane.xlu2 %1291  ;;  %1300 = vadd.xlane.f32.xlu0 %v1299_v44 }
 0x7a9   : > { %v1294_v49 = vmul.f32 %v1292_v45, %v2434_v7 }
 0x7ab   : > { %v1296_v50 = vsub.f32 %v1286_v39, %v1294_v49 }
 0x7ad   : > { %v1298_v51 = vmul.f32 %v1296_v50, %v1296_v50 }
 0x7af   : > { %v1302_v52 = vsel %vm562_vm1, %v1298_v51, 0.0 }
 0x7b0   : > { %1303 = vadd.xlane.f32.xlu1 %v1302_v52 }
 0x81b   : > { %v1301_v53 = vpop.xlane.xlu0 %1300 }
 0x81c   : > { %v1305_v54 = vmul.f32 %v1301_v53, %v2434_v7 }
 0x81e   : > { %v1307_v55 = vadd.f32 1e-05, %v1305_v54 }
 0x820   : > { %1830 = vrsqrt.f32 %v1307_v55  ;;  %vm1315_vm15 = vweird.f32 %v1307_v55 }
 0x823   : > { %v1304_v56 = vpop.xlane.xlu1 %1303 }
 0x824   : > { %v1306_v57 = vmul.f32 %v1304_v56, %v2434_v7 }
 0x826   : > { %v1831_v58 = vpop.eup %1830  ;;  %v1308_v36 = vadd.f32 1e-05, %v1306_v57 }
 0x827   : > { %v1310_v59 = vmul.f32 %v1831_v58, %v1307_v55  ;;  %vm1316_vm14 = vweird.f32 %v1831_v58 }
 0x828   : > { %1832 = vrsqrt.f32 %v1308_v36  ;;  %vm1317_vm0 = vmor %vm1315_vm15, %vm1316_vm14  ;;  %vm1325_vm3 = vweird.f32 %v1308_v36 }
 0x829   : > { %v1311_v60 = vmul.f32 %v1831_v58, %v1310_v59 }
 0x82b   : > { %v1312_v61 = vmul.f32 0.5, %v1311_v60 }
 0x82d   : > { %v1313_v62 = vsub.f32 1.5, %v1312_v61 }
 0x82e   : > { %v1833_v63 = vpop.eup %1832 }
 0x82f   : > { %v1314_v0 = vmul.f32 %v1831_v58, %v1313_v62  ;;  %v1320_v1 = vmul.f32 %v1833_v63, %v1308_v36  ;;  %vm1326_vm2 = vweird.f32 %v1833_v63 }
 0x830   : > { %vm1327_vm4 = vmor %vm1325_vm3, %vm1326_vm2 }
 0x831   : > { %v1318_v3 = vsel %vm1317_vm0, %v1831_v58, %v1314_v0  ;;  %v1321_v4 = vmul.f32 %v1833_v63, %v1320_v1 }
 0x832   : > { %v1329_v7 = vmul.f32 %v1318_v3, %v1295_v43 }
 0x833   : > { %v1322_v6 = vmul.f32 0.5, %v1321_v4 }
 0x834   : > { %v1332_v9 = vmul.f32 %v1331_v2, %v1329_v7 }
 0x835   : > { %v1323_v10 = vsub.f32 1.5, %v1322_v6 }
 0x836   : > { %v1335_v11 = vadd.f32 %v1334_v5, %v1332_v9 }
 0x837   : > { %v1324_v12 = vmul.f32 %v1833_v63, %v1323_v10 }
 0x838   : > { %1337 = vst.msk [vmem:[#allocation2] sm:$0xff] %vm562_vm1, %v1335_v11 }
 0x839   : > { %v1328_v13 = vsel %vm1327_vm4, %v1833_v63, %v1324_v12 }
 0x83a   : > { %v1330_v14 = vmul.f32 %v1328_v13, %v1296_v50 }
 0x83c   : > { %v1333_v15 = vmul.f32 %v1331_v2, %v1330_v14  ;;  %1342 = sbr.rel (%p1624_p12) target bundleno = 2115 (0x843), region = 76 }
 0x83e   : > { %v1336_v16 = vadd.f32 %v1334_v5, %v1333_v15 }
 0x840   : > { %1338 = vst.msk [vmem:[#allocation2 + $0x8] sm:$0xff] %vm562_vm1, %v1336_v16 }
 0x841   : > { %1343 = vst.msk [vmem:[%s2319_s18] sm:$0xff] %vm562_vm1, %v1335_v11 }
 0x842   : > { %1344 = vst.msk [vmem:[%s2319_s18 + $0x8] sm:$0xff] %vm562_vm1, %v1336_v16 }
 0x843 PF: > { %s1644_s2 = sshll.u32 %s2038_s16, 4  ;;  %s2584_s20 = sld [smem:[#allocation31_spill]] }
 0x844   : > { %s1358_s23 = sshll.u32 %s2319_s18, 4  ;;  %s2585_s6 = sand.u32 1, %s2014_s10   ;;  %s1359_s23 = int_to_ptr.vmem [resolvable:$true] %s1358_s23 }
 0x845   : > { %s1346_s9 = scalar_lea.sflag [#allocation5], %s2585_s6 }
 0x849   : > { %s1357_s8 = scalar_lea.hbm %s2584_s20, %s1644_s2  ;;  %s1944_s16 = scalar_lea.hbm %s2584_s20, 32 }
 0x84a   : > { %s1360_s15 = sshll.u32 %s1357_s8, 4  ;;  %s1361_s15 = int_to_ptr.hbm [resolvable:$true] %s1360_s15 }
 0x84b   : > { %s1938_s5 = sshra.s32 %s1361_s15, 4  ;;  %s1939_s5 = int_to_ptr.hbm [resolvable:$true] %s1938_s5 }
 0x84c   : > { %s1940_s26 = scalar_lea.hbm %s1939_s5, 16  ;;  %p1945_p2 = scmp.lt.s32.totalorder %s1939_s5, %s2584_s20 }
 0x84d   : > { %p1941_p13 = scmp.ne.s32.totalorder %s1939_s5, %s1940_s26  ;;  %p1946_p4 = scmp.lt.s32.totalorder %s1944_s16, %s1940_s26 }
 0x84f   : > { %p1942_p0 = pnand %p1941_p13, %p2237_p3  ;;  %p1947_p6 = por %p1946_p4, %p1945_p2 }
 0x851   : > { %p1943_p1 = pneg %p1942_p0 }
 0x853   : > { %p1948_p8 = pnand %p1947_p6, %p1943_p1 }
 0x855   : > { %1951 = shalt.err (!%p1948_p8)
}
 0x856   : > { %s2064_s18 = smov 128  }
 0x857   : > { %1653 = dma.vmem_to_hbm [thread:$0]  (%p2237_p3), %s1359_s23, 256, %s1361_s15, %s1346_s9, %s2064_s18, %s2064_s18, %s2060_s11  }
 0x858 PF: > { %s2586_s1 = sld [smem:[#allocation13_spill]]  ;;  %p1673_p10 = scmp.ge.s32.totalorder %s2050_s19, 2 }
 0x85a   : > { %p1667_p7 = pnand %p1673_p10, %p2242_p5 }
 0x85c   : > { %p1668_p9 = pneg %p1667_p7 }
 0x85e   : > { %s1375_s14 = sand.u32 1, %s2586_s1  }
 0x85f   : > { %s1376_s17 = scalar_lea.sflag [#allocation5], %s1375_s14 }
 0x860   : > { %2005 = dma.done.wait (%p1668_p9), %s1376_s17, 256  }
 0x861   : > { %2007 = vsyncadd (%p1668_p9), %s1376_s17, 4294967040  ;;  %s26_s19 = sadd.s32 1, %s2050_s19   ;;  %s2588_s25 = sld [smem:[#allocation14_spill]] }
 0x862   : > { %p23_p11 = scmp.ge.s32.totalorder %s26_s19, 6   ;;  %s2589_s11 = sld [smem:[#allocation22_spill]] }
 0x863   : > { %s2590_s12 = sld [smem:[#allocation15_spill]]  ;;  %s2597_s30 = smov %s2014_s10 }
 0x864   : > { %s2591_s13 = sld [smem:[#allocation16_spill]] }
 0x865   : > { %s2592_s14 = sld [smem:[#allocation21_spill]]  ;;  %25 = sbr.rel (!%p23_p11) target bundleno = 19 (0x13), region = 143 }
 0x866   : > { %s2593_s15 = sld [smem:[#allocation17_spill]] }
 0x867   : > { %s2594_s16 = sld [smem:[#allocation18_spill]]  ;;  %s2598_s10 = smov %s2588_s25 }
 0x868   : > { %s2595_s17 = sld [smem:[#allocation19_spill]] }
 0x869   : > { %s2596_s18 = sld [smem:[#allocation20_spill]] }
 0x86a   :  { %1382 = vsyncpa [#allocation4], 1 }
 0x86b   :  { %1384 = vsyncpa [#allocation4 + $0x1], 1 }
 0x86c   :  { %1385 = vsyncpa [#allocation7], 1 }
 0x86d   :  { %1387 = vsyncpa [#allocation7 + $0x1], 1 }
 0x86e   :  { %1388 = vsyncpa [#allocation5], 1 }
 0x86f   :  { %1390 = vsyncpa [#allocation5 + $0x1], 1 }

</bundles_post_ra>
